<compile_context>
chip_gen: v7x
topology: tpu7x:2x2x1
jax: 0.10.0
libtpu: 0.0.40
codegen_flags: <defaults>
</compile_context>

<pallas_src>
import functools

import jax
import jax.numpy as jnp
from jax.experimental import pallas as pl
from jax.experimental.pallas import tpu as pltpu


# ----------------------------- Pallas kernel -------------------------------


def _fused_conv_pool_fc_kernel(x_ref, w_ref, cb_ref, mask_ref, fcw_ref, fcb_ref, o_ref,
                               *, H, W, WP, C_in, C_out):
    """Fused Conv3x3(pad=1) + bias + ReLU + global-avg-pool + FC for one batch element.

    x_ref   : (C_in, LPAD) f32  zero-padded image, spatial flattened row-major with row
              stride WP = W + 2, lane-padded out to LPAD.
    w_ref   : (C_out, C_in*9) f32  conv weights, column index = ci*9 + kh*3 + kw.
    cb_ref  : (C_out, 1) f32 conv bias (broadcasts over lanes).
    mask_ref: (1, H*WP) f32  1/(H*W) at valid spatial positions, 0 at pad columns.
    fcw_ref : (C_out, NC) f32, fcb_ref: (1, NC) f32.
    o_ref   : (1, NC) f32 logits for this batch element.
    """
    L = H * WP                         # contiguous conv-output positions (incl. pad columns)
    x = x_ref[...]                     # (C_in, LPAD), one aligned VMEM load

    acc = jnp.zeros((C_out, L), jnp.float32)
    # 3x3 conv as 9 shifted windows; each tap is C_in rank-1 (outer-product) VPU FMAs with the
    # spatial axis on lanes, so the accumulator stays lane-dense (8 sublanes x 288 lanes).
    for kh in range(3):
        for kw in range(3):
            off = kh * WP + kw
            xs = x[:, off:off + L]                                        # (C_in, L)
            for ci in range(C_in):
                c = ci * 9 + kh * 3 + kw
                wc = w_ref[:, c:c + 1]                                    # (C_out, 1)
                acc = acc + wc * xs[ci:ci + 1, :]                         # (C_out, L)

    act = jnp.maximum(acc + cb_ref[...], 0.0)                             # bias + ReLU

    # Global average pool: mask out pad columns (mask already folded with 1/(H*W)) and reduce
    # over the lane axis of dense vregs.
    pooled = jnp.sum(act * mask_ref[...], axis=1, keepdims=True)          # (C_out, 1)

    # FC head: (C_out,1)*(C_out,NC) -> sublane reduce -> (1, NC); avoids tiny transposes/MXU.
    logits = jnp.sum(pooled * fcw_ref[...], axis=0, keepdims=True) + fcb_ref[...]
    o_ref[...] = logits.astype(o_ref.dtype)


# ----------------------------- wrapper --------------------------------------


@jax.jit
def vision_module_forward(x_nchw, conv_w, conv_b, fc_w, fc_b):
    """x_nchw: (B, C_in, H, W) f32 -> (B, num_classes) f32 logits."""
    B, C, H, W = x_nchw.shape
    C_out = conv_w.shape[0]
    NC = fc_w.shape[1]
    HP, WP = H + 2, W + 2
    L = H * WP

    # Glue (plain JAX): zero-pad spatially and flatten spatial row-major (~1.3x copy of the
    # small input; NO 9x im2col blow-up in HBM). Lane-pad so every shifted window is in range.
    xp = jnp.pad(x_nchw, ((0, 0), (0, 0), (1, 1), (1, 1)))                # (B, C, HP, WP)
    need = L + 2 * WP + 2                                                 # max flat index + 1
    LPAD = ((max(need, HP * WP) + 127) // 128) * 128
    x_flat = jnp.pad(xp.reshape(B, C, HP * WP),
                     ((0, 0), (0, 0), (0, LPAD - HP * WP)))               # (B, C, LPAD)

    w2 = conv_w.reshape(C_out, C * 9)
    cb = conv_b.reshape(C_out, 1)
    fb = fc_b.reshape(1, NC)
    col = jnp.arange(L, dtype=jnp.int32) % WP
    mask = jnp.where(col < W, 1.0 / (H * W), 0.0).astype(jnp.float32).reshape(1, L)

    kernel = functools.partial(_fused_conv_pool_fc_kernel,
                               H=H, W=W, WP=WP, C_in=C, C_out=C_out)

    flops = 2 * B * H * W * C * 9 * C_out + B * H * W * C_out + 2 * B * C_out * NC
    bytes_accessed = 4 * (x_flat.size + w2.size + cb.size + mask.size
                          + fc_w.size + fb.size + B * NC)

    out3 = pl.pallas_call(
        kernel,
        out_shape=jax.ShapeDtypeStruct((B, 1, NC), jnp.float32),
        grid=(B,),
        in_specs=[
            pl.BlockSpec((None, C, LPAD), lambda b: (b, 0, 0)),
            pl.BlockSpec((C_out, C * 9), lambda b: (0, 0)),
            pl.BlockSpec((C_out, 1), lambda b: (0, 0)),
            pl.BlockSpec((1, L), lambda b: (0, 0)),
            pl.BlockSpec((C_out, NC), lambda b: (0, 0)),
            pl.BlockSpec((1, NC), lambda b: (0, 0)),
        ],
        out_specs=pl.BlockSpec((None, 1, NC), lambda b: (b, 0, 0)),
        compiler_params=pltpu.CompilerParams(
            dimension_semantics=("parallel",)),
        cost_estimate=pl.CostEstimate(flops=flops, transcendentals=0,
                                      bytes_accessed=bytes_accessed),
    )(x_flat, w2, cb, mask, fc_w, fb)

    return out3.reshape(B, NC)


# ----------------------------- main ------------------------------------------

if __name__ == "__main__":
    key = jax.random.PRNGKey(0)
    k_x, k_cw, k_cb, k_fw, k_fb = jax.random.split(key, 5)

    B, C_in, H, W = 2, 4, 16, 16
    C_out, num_classes = 8, 10

    x = jax.random.normal(k_x, (B, C_in, H, W), dtype=jnp.float32)
    conv_w = 0.1 * jax.random.normal(k_cw, (C_out, C_in, 3, 3), dtype=jnp.float32)
    conv_b = 0.1 * jax.random.normal(k_cb, (C_out,), dtype=jnp.float32)
    fc_w = 0.1 * jax.random.normal(k_fw, (C_out, num_classes), dtype=jnp.float32)
    fc_b = 0.1 * jax.random.normal(k_fb, (num_classes,), dtype=jnp.float32)

    logits = vision_module_forward(x, conv_w, conv_b, fc_w, fc_b)
    jax.block_until_ready(logits)

    # Cross-check against a pure-JAX reference of the same model.
    ref_conv = jax.lax.conv_general_dilated(
        x, conv_w, window_strides=(1, 1), padding="SAME",
        dimension_numbers=("NCHW", "OIHW", "NCHW"))
    ref_act = jnp.maximum(ref_conv + conv_b[None, :, None, None], 0.0)
    ref_logits = jnp.mean(ref_act, axis=(2, 3)) @ fc_w + fc_b
    assert logits.shape == (B, num_classes)
    assert jnp.allclose(logits, ref_logits, atol=1e-4, rtol=1e-4), "mismatch vs reference"

    print("KERNEL_OK")
</pallas_src>

<mosaic_0001>
module attributes {stable_mosaic.version = 11 : i64} {
  func.func @_fused_conv_pool_fc_kernel(%arg0: i32, %arg1: memref<1x4x384xf32, #tpu.memory_space<vmem>>, %arg2: memref<8x36xf32, #tpu.memory_space<vmem>>, %arg3: memref<8x1xf32, #tpu.memory_space<vmem>>, %arg4: memref<1x288xf32, #tpu.memory_space<vmem>>, %arg5: memref<8x10xf32, #tpu.memory_space<vmem>>, %arg6: memref<1x10xf32, #tpu.memory_space<vmem>>, %arg7: memref<1x1x10xf32, #tpu.memory_space<vmem>>) attributes {dimension_semantics = [#tpu.dimension_semantics<parallel>], iteration_bounds = array<i64: 2>, scalar_prefetch = 0 : i64, scratch_operands = 0 : i64, tpu.core_type = #tpu.core_type<tc>, window_params = [{transform_indices = @transform_0, window_bounds = array<i64: 1, 4, 384>}, {pipeline_mode = #tpu.pipeline_mode<synchronous>, transform_indices = @transform_1, window_bounds = array<i64: 8, 36>}, {pipeline_mode = #tpu.pipeline_mode<synchronous>, transform_indices = @transform_2, window_bounds = array<i64: 8, 1>}, {pipeline_mode = #tpu.pipeline_mode<synchronous>, transform_indices = @transform_3, window_bounds = array<i64: 1, 288>}, {pipeline_mode = #tpu.pipeline_mode<synchronous>, transform_indices = @transform_4, window_bounds = array<i64: 8, 10>}, {pipeline_mode = #tpu.pipeline_mode<synchronous>, transform_indices = @transform_5, window_bounds = array<i64: 1, 10>}, {transform_indices = @transform_6, window_bounds = array<i64: 1, 1, 10>}]} {
    %c0 = arith.constant 0 : index
    %c0_0 = arith.constant 0 : index
    %c0_1 = arith.constant 0 : index
    %0 = vector.load %arg1[%c0, %c0_0, %c0_1] : memref<1x4x384xf32, #tpu.memory_space<vmem>>, vector<1x4x384xf32>
    %1 = vector.shape_cast %0 : vector<1x4x384xf32> to vector<4x384xf32>
    %cst = arith.constant 0.000000e+00 : f32
    %2 = vector.broadcast %cst : f32 to vector<8x288xf32>
    %3 = vector.extract_strided_slice %1 {offsets = [0, 0], sizes = [4, 288], strides = [1, 1]} : vector<4x384xf32> to vector<4x288xf32>
    %c0_2 = arith.constant 0 : index
    %c0_3 = arith.constant 0 : index
    %4 = vector.load %arg2[%c0_2, %c0_3] : memref<8x36xf32, #tpu.memory_space<vmem>>, vector<8x1xf32>
    %5 = vector.extract_strided_slice %3 {offsets = [0, 0], sizes = [1, 288], strides = [1, 1]} : vector<4x288xf32> to vector<1x288xf32>
    %6 = vector.broadcast %4 : vector<8x1xf32> to vector<8x288xf32>
    %7 = vector.broadcast %5 : vector<1x288xf32> to vector<8x288xf32>
    %8 = arith.mulf %6, %7 : vector<8x288xf32>
    %9 = arith.addf %2, %8 : vector<8x288xf32>
    %c0_4 = arith.constant 0 : index
    %c9 = arith.constant 9 : index
    %10 = vector.load %arg2[%c0_4, %c9] : memref<8x36xf32, #tpu.memory_space<vmem>>, vector<8x1xf32>
    %11 = vector.extract_strided_slice %3 {offsets = [1, 0], sizes = [1, 288], strides = [1, 1]} : vector<4x288xf32> to vector<1x288xf32>
    %12 = vector.broadcast %10 : vector<8x1xf32> to vector<8x288xf32>
    %13 = vector.broadcast %11 : vector<1x288xf32> to vector<8x288xf32>
    %14 = arith.mulf %12, %13 : vector<8x288xf32>
    %15 = arith.addf %9, %14 : vector<8x288xf32>
    %c0_5 = arith.constant 0 : index
    %c18 = arith.constant 18 : index
    %16 = vector.load %arg2[%c0_5, %c18] : memref<8x36xf32, #tpu.memory_space<vmem>>, vector<8x1xf32>
    %17 = vector.extract_strided_slice %3 {offsets = [2, 0], sizes = [1, 288], strides = [1, 1]} : vector<4x288xf32> to vector<1x288xf32>
    %18 = vector.broadcast %16 : vector<8x1xf32> to vector<8x288xf32>
    %19 = vector.broadcast %17 : vector<1x288xf32> to vector<8x288xf32>
    %20 = arith.mulf %18, %19 : vector<8x288xf32>
    %21 = arith.addf %15, %20 : vector<8x288xf32>
    %c0_6 = arith.constant 0 : index
    %c27 = arith.constant 27 : index
    %22 = vector.load %arg2[%c0_6, %c27] : memref<8x36xf32, #tpu.memory_space<vmem>>, vector<8x1xf32>
    %23 = vector.extract_strided_slice %3 {offsets = [3, 0], sizes = [1, 288], strides = [1, 1]} : vector<4x288xf32> to vector<1x288xf32>
    %24 = vector.broadcast %22 : vector<8x1xf32> to vector<8x288xf32>
    %25 = vector.broadcast %23 : vector<1x288xf32> to vector<8x288xf32>
    %26 = arith.mulf %24, %25 : vector<8x288xf32>
    %27 = arith.addf %21, %26 : vector<8x288xf32>
    %28 = vector.extract_strided_slice %1 {offsets = [0, 1], sizes = [4, 288], strides = [1, 1]} : vector<4x384xf32> to vector<4x288xf32>
    %c0_7 = arith.constant 0 : index
    %c1 = arith.constant 1 : index
    %29 = vector.load %arg2[%c0_7, %c1] : memref<8x36xf32, #tpu.memory_space<vmem>>, vector<8x1xf32>
    %30 = vector.extract_strided_slice %28 {offsets = [0, 0], sizes = [1, 288], strides = [1, 1]} : vector<4x288xf32> to vector<1x288xf32>
    %31 = vector.broadcast %29 : vector<8x1xf32> to vector<8x288xf32>
    %32 = vector.broadcast %30 : vector<1x288xf32> to vector<8x288xf32>
    %33 = arith.mulf %31, %32 : vector<8x288xf32>
    %34 = arith.addf %27, %33 : vector<8x288xf32>
    %c0_8 = arith.constant 0 : index
    %c10 = arith.constant 10 : index
    %35 = vector.load %arg2[%c0_8, %c10] : memref<8x36xf32, #tpu.memory_space<vmem>>, vector<8x1xf32>
    %36 = vector.extract_strided_slice %28 {offsets = [1, 0], sizes = [1, 288], strides = [1, 1]} : vector<4x288xf32> to vector<1x288xf32>
    %37 = vector.broadcast %35 : vector<8x1xf32> to vector<8x288xf32>
    %38 = vector.broadcast %36 : vector<1x288xf32> to vector<8x288xf32>
    %39 = arith.mulf %37, %38 : vector<8x288xf32>
    %40 = arith.addf %34, %39 : vector<8x288xf32>
    %c0_9 = arith.constant 0 : index
    %c19 = arith.constant 19 : index
    %41 = vector.load %arg2[%c0_9, %c19] : memref<8x36xf32, #tpu.memory_space<vmem>>, vector<8x1xf32>
    %42 = vector.extract_strided_slice %28 {offsets = [2, 0], sizes = [1, 288], strides = [1, 1]} : vector<4x288xf32> to vector<1x288xf32>
    %43 = vector.broadcast %41 : vector<8x1xf32> to vector<8x288xf32>
    %44 = vector.broadcast %42 : vector<1x288xf32> to vector<8x288xf32>
    %45 = arith.mulf %43, %44 : vector<8x288xf32>
    %46 = arith.addf %40, %45 : vector<8x288xf32>
    %c0_10 = arith.constant 0 : index
    %c28 = arith.constant 28 : index
    %47 = vector.load %arg2[%c0_10, %c28] : memref<8x36xf32, #tpu.memory_space<vmem>>, vector<8x1xf32>
    %48 = vector.extract_strided_slice %28 {offsets = [3, 0], sizes = [1, 288], strides = [1, 1]} : vector<4x288xf32> to vector<1x288xf32>
    %49 = vector.broadcast %47 : vector<8x1xf32> to vector<8x288xf32>
    %50 = vector.broadcast %48 : vector<1x288xf32> to vector<8x288xf32>
    %51 = arith.mulf %49, %50 : vector<8x288xf32>
    %52 = arith.addf %46, %51 : vector<8x288xf32>
    %53 = vector.extract_strided_slice %1 {offsets = [0, 2], sizes = [4, 288], strides = [1, 1]} : vector<4x384xf32> to vector<4x288xf32>
    %c0_11 = arith.constant 0 : index
    %c2 = arith.constant 2 : index
    %54 = vector.load %arg2[%c0_11, %c2] : memref<8x36xf32, #tpu.memory_space<vmem>>, vector<8x1xf32>
    %55 = vector.extract_strided_slice %53 {offsets = [0, 0], sizes = [1, 288], strides = [1, 1]} : vector<4x288xf32> to vector<1x288xf32>
    %56 = vector.broadcast %54 : vector<8x1xf32> to vector<8x288xf32>
    %57 = vector.broadcast %55 : vector<1x288xf32> to vector<8x288xf32>
    %58 = arith.mulf %56, %57 : vector<8x288xf32>
    %59 = arith.addf %52, %58 : vector<8x288xf32>
    %c0_12 = arith.constant 0 : index
    %c11 = arith.constant 11 : index
    %60 = vector.load %arg2[%c0_12, %c11] : memref<8x36xf32, #tpu.memory_space<vmem>>, vector<8x1xf32>
    %61 = vector.extract_strided_slice %53 {offsets = [1, 0], sizes = [1, 288], strides = [1, 1]} : vector<4x288xf32> to vector<1x288xf32>
    %62 = vector.broadcast %60 : vector<8x1xf32> to vector<8x288xf32>
    %63 = vector.broadcast %61 : vector<1x288xf32> to vector<8x288xf32>
    %64 = arith.mulf %62, %63 : vector<8x288xf32>
    %65 = arith.addf %59, %64 : vector<8x288xf32>
    %c0_13 = arith.constant 0 : index
    %c20 = arith.constant 20 : index
    %66 = vector.load %arg2[%c0_13, %c20] : memref<8x36xf32, #tpu.memory_space<vmem>>, vector<8x1xf32>
    %67 = vector.extract_strided_slice %53 {offsets = [2, 0], sizes = [1, 288], strides = [1, 1]} : vector<4x288xf32> to vector<1x288xf32>
    %68 = vector.broadcast %66 : vector<8x1xf32> to vector<8x288xf32>
    %69 = vector.broadcast %67 : vector<1x288xf32> to vector<8x288xf32>
    %70 = arith.mulf %68, %69 : vector<8x288xf32>
    %71 = arith.addf %65, %70 : vector<8x288xf32>
    %c0_14 = arith.constant 0 : index
    %c29 = arith.constant 29 : index
    %72 = vector.load %arg2[%c0_14, %c29] : memref<8x36xf32, #tpu.memory_space<vmem>>, vector<8x1xf32>
    %73 = vector.extract_strided_slice %53 {offsets = [3, 0], sizes = [1, 288], strides = [1, 1]} : vector<4x288xf32> to vector<1x288xf32>
    %74 = vector.broadcast %72 : vector<8x1xf32> to vector<8x288xf32>
    %75 = vector.broadcast %73 : vector<1x288xf32> to vector<8x288xf32>
    %76 = arith.mulf %74, %75 : vector<8x288xf32>
    %77 = arith.addf %71, %76 : vector<8x288xf32>
    %78 = vector.extract_strided_slice %1 {offsets = [0, 18], sizes = [4, 288], strides = [1, 1]} : vector<4x384xf32> to vector<4x288xf32>
    %c0_15 = arith.constant 0 : index
    %c3 = arith.constant 3 : index
    %79 = vector.load %arg2[%c0_15, %c3] : memref<8x36xf32, #tpu.memory_space<vmem>>, vector<8x1xf32>
    %80 = vector.extract_strided_slice %78 {offsets = [0, 0], sizes = [1, 288], strides = [1, 1]} : vector<4x288xf32> to vector<1x288xf32>
    %81 = vector.broadcast %79 : vector<8x1xf32> to vector<8x288xf32>
    %82 = vector.broadcast %80 : vector<1x288xf32> to vector<8x288xf32>
    %83 = arith.mulf %81, %82 : vector<8x288xf32>
    %84 = arith.addf %77, %83 : vector<8x288xf32>
    %c0_16 = arith.constant 0 : index
    %c12 = arith.constant 12 : index
    %85 = vector.load %arg2[%c0_16, %c12] : memref<8x36xf32, #tpu.memory_space<vmem>>, vector<8x1xf32>
    %86 = vector.extract_strided_slice %78 {offsets = [1, 0], sizes = [1, 288], strides = [1, 1]} : vector<4x288xf32> to vector<1x288xf32>
    %87 = vector.broadcast %85 : vector<8x1xf32> to vector<8x288xf32>
    %88 = vector.broadcast %86 : vector<1x288xf32> to vector<8x288xf32>
    %89 = arith.mulf %87, %88 : vector<8x288xf32>
    %90 = arith.addf %84, %89 : vector<8x288xf32>
    %c0_17 = arith.constant 0 : index
    %c21 = arith.constant 21 : index
    %91 = vector.load %arg2[%c0_17, %c21] : memref<8x36xf32, #tpu.memory_space<vmem>>, vector<8x1xf32>
    %92 = vector.extract_strided_slice %78 {offsets = [2, 0], sizes = [1, 288], strides = [1, 1]} : vector<4x288xf32> to vector<1x288xf32>
    %93 = vector.broadcast %91 : vector<8x1xf32> to vector<8x288xf32>
    %94 = vector.broadcast %92 : vector<1x288xf32> to vector<8x288xf32>
    %95 = arith.mulf %93, %94 : vector<8x288xf32>
    %96 = arith.addf %90, %95 : vector<8x288xf32>
    %c0_18 = arith.constant 0 : index
    %c30 = arith.constant 30 : index
    %97 = vector.load %arg2[%c0_18, %c30] : memref<8x36xf32, #tpu.memory_space<vmem>>, vector<8x1xf32>
    %98 = vector.extract_strided_slice %78 {offsets = [3, 0], sizes = [1, 288], strides = [1, 1]} : vector<4x288xf32> to vector<1x288xf32>
    %99 = vector.broadcast %97 : vector<8x1xf32> to vector<8x288xf32>
    %100 = vector.broadcast %98 : vector<1x288xf32> to vector<8x288xf32>
    %101 = arith.mulf %99, %100 : vector<8x288xf32>
    %102 = arith.addf %96, %101 : vector<8x288xf32>
    %103 = vector.extract_strided_slice %1 {offsets = [0, 19], sizes = [4, 288], strides = [1, 1]} : vector<4x384xf32> to vector<4x288xf32>
    %c0_19 = arith.constant 0 : index
    %c4 = arith.constant 4 : index
    %104 = vector.load %arg2[%c0_19, %c4] : memref<8x36xf32, #tpu.memory_space<vmem>>, vector<8x1xf32>
    %105 = vector.extract_strided_slice %103 {offsets = [0, 0], sizes = [1, 288], strides = [1, 1]} : vector<4x288xf32> to vector<1x288xf32>
    %106 = vector.broadcast %104 : vector<8x1xf32> to vector<8x288xf32>
    %107 = vector.broadcast %105 : vector<1x288xf32> to vector<8x288xf32>
    %108 = arith.mulf %106, %107 : vector<8x288xf32>
    %109 = arith.addf %102, %108 : vector<8x288xf32>
    %c0_20 = arith.constant 0 : index
    %c13 = arith.constant 13 : index
    %110 = vector.load %arg2[%c0_20, %c13] : memref<8x36xf32, #tpu.memory_space<vmem>>, vector<8x1xf32>
    %111 = vector.extract_strided_slice %103 {offsets = [1, 0], sizes = [1, 288], strides = [1, 1]} : vector<4x288xf32> to vector<1x288xf32>
    %112 = vector.broadcast %110 : vector<8x1xf32> to vector<8x288xf32>
    %113 = vector.broadcast %111 : vector<1x288xf32> to vector<8x288xf32>
    %114 = arith.mulf %112, %113 : vector<8x288xf32>
    %115 = arith.addf %109, %114 : vector<8x288xf32>
    %c0_21 = arith.constant 0 : index
    %c22 = arith.constant 22 : index
    %116 = vector.load %arg2[%c0_21, %c22] : memref<8x36xf32, #tpu.memory_space<vmem>>, vector<8x1xf32>
    %117 = vector.extract_strided_slice %103 {offsets = [2, 0], sizes = [1, 288], strides = [1, 1]} : vector<4x288xf32> to vector<1x288xf32>
    %118 = vector.broadcast %116 : vector<8x1xf32> to vector<8x288xf32>
    %119 = vector.broadcast %117 : vector<1x288xf32> to vector<8x288xf32>
    %120 = arith.mulf %118, %119 : vector<8x288xf32>
    %121 = arith.addf %115, %120 : vector<8x288xf32>
    %c0_22 = arith.constant 0 : index
    %c31 = arith.constant 31 : index
    %122 = vector.load %arg2[%c0_22, %c31] : memref<8x36xf32, #tpu.memory_space<vmem>>, vector<8x1xf32>
    %123 = vector.extract_strided_slice %103 {offsets = [3, 0], sizes = [1, 288], strides = [1, 1]} : vector<4x288xf32> to vector<1x288xf32>
    %124 = vector.broadcast %122 : vector<8x1xf32> to vector<8x288xf32>
    %125 = vector.broadcast %123 : vector<1x288xf32> to vector<8x288xf32>
    %126 = arith.mulf %124, %125 : vector<8x288xf32>
    %127 = arith.addf %121, %126 : vector<8x288xf32>
    %128 = vector.extract_strided_slice %1 {offsets = [0, 20], sizes = [4, 288], strides = [1, 1]} : vector<4x384xf32> to vector<4x288xf32>
    %c0_23 = arith.constant 0 : index
    %c5 = arith.constant 5 : index
    %129 = vector.load %arg2[%c0_23, %c5] : memref<8x36xf32, #tpu.memory_space<vmem>>, vector<8x1xf32>
    %130 = vector.extract_strided_slice %128 {offsets = [0, 0], sizes = [1, 288], strides = [1, 1]} : vector<4x288xf32> to vector<1x288xf32>
    %131 = vector.broadcast %129 : vector<8x1xf32> to vector<8x288xf32>
    %132 = vector.broadcast %130 : vector<1x288xf32> to vector<8x288xf32>
    %133 = arith.mulf %131, %132 : vector<8x288xf32>
    %134 = arith.addf %127, %133 : vector<8x288xf32>
    %c0_24 = arith.constant 0 : index
    %c14 = arith.constant 14 : index
    %135 = vector.load %arg2[%c0_24, %c14] : memref<8x36xf32, #tpu.memory_space<vmem>>, vector<8x1xf32>
    %136 = vector.extract_strided_slice %128 {offsets = [1, 0], sizes = [1, 288], strides = [1, 1]} : vector<4x288xf32> to vector<1x288xf32>
    %137 = vector.broadcast %135 : vector<8x1xf32> to vector<8x288xf32>
    %138 = vector.broadcast %136 : vector<1x288xf32> to vector<8x288xf32>
    %139 = arith.mulf %137, %138 : vector<8x288xf32>
    %140 = arith.addf %134, %139 : vector<8x288xf32>
    %c0_25 = arith.constant 0 : index
    %c23 = arith.constant 23 : index
    %141 = vector.load %arg2[%c0_25, %c23] : memref<8x36xf32, #tpu.memory_space<vmem>>, vector<8x1xf32>
    %142 = vector.extract_strided_slice %128 {offsets = [2, 0], sizes = [1, 288], strides = [1, 1]} : vector<4x288xf32> to vector<1x288xf32>
    %143 = vector.broadcast %141 : vector<8x1xf32> to vector<8x288xf32>
    %144 = vector.broadcast %142 : vector<1x288xf32> to vector<8x288xf32>
    %145 = arith.mulf %143, %144 : vector<8x288xf32>
    %146 = arith.addf %140, %145 : vector<8x288xf32>
    %c0_26 = arith.constant 0 : index
    %c32 = arith.constant 32 : index
    %147 = vector.load %arg2[%c0_26, %c32] : memref<8x36xf32, #tpu.memory_space<vmem>>, vector<8x1xf32>
    %148 = vector.extract_strided_slice %128 {offsets = [3, 0], sizes = [1, 288], strides = [1, 1]} : vector<4x288xf32> to vector<1x288xf32>
    %149 = vector.broadcast %147 : vector<8x1xf32> to vector<8x288xf32>
    %150 = vector.broadcast %148 : vector<1x288xf32> to vector<8x288xf32>
    %151 = arith.mulf %149, %150 : vector<8x288xf32>
    %152 = arith.addf %146, %151 : vector<8x288xf32>
    %153 = vector.extract_strided_slice %1 {offsets = [0, 36], sizes = [4, 288], strides = [1, 1]} : vector<4x384xf32> to vector<4x288xf32>
    %c0_27 = arith.constant 0 : index
    %c6 = arith.constant 6 : index
    %154 = vector.load %arg2[%c0_27, %c6] : memref<8x36xf32, #tpu.memory_space<vmem>>, vector<8x1xf32>
    %155 = vector.extract_strided_slice %153 {offsets = [0, 0], sizes = [1, 288], strides = [1, 1]} : vector<4x288xf32> to vector<1x288xf32>
    %156 = vector.broadcast %154 : vector<8x1xf32> to vector<8x288xf32>
    %157 = vector.broadcast %155 : vector<1x288xf32> to vector<8x288xf32>
    %158 = arith.mulf %156, %157 : vector<8x288xf32>
    %159 = arith.addf %152, %158 : vector<8x288xf32>
    %c0_28 = arith.constant 0 : index
    %c15 = arith.constant 15 : index
    %160 = vector.load %arg2[%c0_28, %c15] : memref<8x36xf32, #tpu.memory_space<vmem>>, vector<8x1xf32>
    %161 = vector.extract_strided_slice %153 {offsets = [1, 0], sizes = [1, 288], strides = [1, 1]} : vector<4x288xf32> to vector<1x288xf32>
    %162 = vector.broadcast %160 : vector<8x1xf32> to vector<8x288xf32>
    %163 = vector.broadcast %161 : vector<1x288xf32> to vector<8x288xf32>
    %164 = arith.mulf %162, %163 : vector<8x288xf32>
    %165 = arith.addf %159, %164 : vector<8x288xf32>
    %c0_29 = arith.constant 0 : index
    %c24 = arith.constant 24 : index
    %166 = vector.load %arg2[%c0_29, %c24] : memref<8x36xf32, #tpu.memory_space<vmem>>, vector<8x1xf32>
    %167 = vector.extract_strided_slice %153 {offsets = [2, 0], sizes = [1, 288], strides = [1, 1]} : vector<4x288xf32> to vector<1x288xf32>
    %168 = vector.broadcast %166 : vector<8x1xf32> to vector<8x288xf32>
    %169 = vector.broadcast %167 : vector<1x288xf32> to vector<8x288xf32>
    %170 = arith.mulf %168, %169 : vector<8x288xf32>
    %171 = arith.addf %165, %170 : vector<8x288xf32>
    %c0_30 = arith.constant 0 : index
    %c33 = arith.constant 33 : index
    %172 = vector.load %arg2[%c0_30, %c33] : memref<8x36xf32, #tpu.memory_space<vmem>>, vector<8x1xf32>
    %173 = vector.extract_strided_slice %153 {offsets = [3, 0], sizes = [1, 288], strides = [1, 1]} : vector<4x288xf32> to vector<1x288xf32>
    %174 = vector.broadcast %172 : vector<8x1xf32> to vector<8x288xf32>
    %175 = vector.broadcast %173 : vector<1x288xf32> to vector<8x288xf32>
    %176 = arith.mulf %174, %175 : vector<8x288xf32>
    %177 = arith.addf %171, %176 : vector<8x288xf32>
    %178 = vector.extract_strided_slice %1 {offsets = [0, 37], sizes = [4, 288], strides = [1, 1]} : vector<4x384xf32> to vector<4x288xf32>
    %c0_31 = arith.constant 0 : index
    %c7 = arith.constant 7 : index
    %179 = vector.load %arg2[%c0_31, %c7] : memref<8x36xf32, #tpu.memory_space<vmem>>, vector<8x1xf32>
    %180 = vector.extract_strided_slice %178 {offsets = [0, 0], sizes = [1, 288], strides = [1, 1]} : vector<4x288xf32> to vector<1x288xf32>
    %181 = vector.broadcast %179 : vector<8x1xf32> to vector<8x288xf32>
    %182 = vector.broadcast %180 : vector<1x288xf32> to vector<8x288xf32>
    %183 = arith.mulf %181, %182 : vector<8x288xf32>
    %184 = arith.addf %177, %183 : vector<8x288xf32>
    %c0_32 = arith.constant 0 : index
    %c16 = arith.constant 16 : index
    %185 = vector.load %arg2[%c0_32, %c16] : memref<8x36xf32, #tpu.memory_space<vmem>>, vector<8x1xf32>
    %186 = vector.extract_strided_slice %178 {offsets = [1, 0], sizes = [1, 288], strides = [1, 1]} : vector<4x288xf32> to vector<1x288xf32>
    %187 = vector.broadcast %185 : vector<8x1xf32> to vector<8x288xf32>
    %188 = vector.broadcast %186 : vector<1x288xf32> to vector<8x288xf32>
    %189 = arith.mulf %187, %188 : vector<8x288xf32>
    %190 = arith.addf %184, %189 : vector<8x288xf32>
    %c0_33 = arith.constant 0 : index
    %c25 = arith.constant 25 : index
    %191 = vector.load %arg2[%c0_33, %c25] : memref<8x36xf32, #tpu.memory_space<vmem>>, vector<8x1xf32>
    %192 = vector.extract_strided_slice %178 {offsets = [2, 0], sizes = [1, 288], strides = [1, 1]} : vector<4x288xf32> to vector<1x288xf32>
    %193 = vector.broadcast %191 : vector<8x1xf32> to vector<8x288xf32>
    %194 = vector.broadcast %192 : vector<1x288xf32> to vector<8x288xf32>
    %195 = arith.mulf %193, %194 : vector<8x288xf32>
    %196 = arith.addf %190, %195 : vector<8x288xf32>
    %c0_34 = arith.constant 0 : index
    %c34 = arith.constant 34 : index
    %197 = vector.load %arg2[%c0_34, %c34] : memref<8x36xf32, #tpu.memory_space<vmem>>, vector<8x1xf32>
    %198 = vector.extract_strided_slice %178 {offsets = [3, 0], sizes = [1, 288], strides = [1, 1]} : vector<4x288xf32> to vector<1x288xf32>
    %199 = vector.broadcast %197 : vector<8x1xf32> to vector<8x288xf32>
    %200 = vector.broadcast %198 : vector<1x288xf32> to vector<8x288xf32>
    %201 = arith.mulf %199, %200 : vector<8x288xf32>
    %202 = arith.addf %196, %201 : vector<8x288xf32>
    %203 = vector.extract_strided_slice %1 {offsets = [0, 38], sizes = [4, 288], strides = [1, 1]} : vector<4x384xf32> to vector<4x288xf32>
    %c0_35 = arith.constant 0 : index
    %c8 = arith.constant 8 : index
    %204 = vector.load %arg2[%c0_35, %c8] : memref<8x36xf32, #tpu.memory_space<vmem>>, vector<8x1xf32>
    %205 = vector.extract_strided_slice %203 {offsets = [0, 0], sizes = [1, 288], strides = [1, 1]} : vector<4x288xf32> to vector<1x288xf32>
    %206 = vector.broadcast %204 : vector<8x1xf32> to vector<8x288xf32>
    %207 = vector.broadcast %205 : vector<1x288xf32> to vector<8x288xf32>
    %208 = arith.mulf %206, %207 : vector<8x288xf32>
    %209 = arith.addf %202, %208 : vector<8x288xf32>
    %c0_36 = arith.constant 0 : index
    %c17 = arith.constant 17 : index
    %210 = vector.load %arg2[%c0_36, %c17] : memref<8x36xf32, #tpu.memory_space<vmem>>, vector<8x1xf32>
    %211 = vector.extract_strided_slice %203 {offsets = [1, 0], sizes = [1, 288], strides = [1, 1]} : vector<4x288xf32> to vector<1x288xf32>
    %212 = vector.broadcast %210 : vector<8x1xf32> to vector<8x288xf32>
    %213 = vector.broadcast %211 : vector<1x288xf32> to vector<8x288xf32>
    %214 = arith.mulf %212, %213 : vector<8x288xf32>
    %215 = arith.addf %209, %214 : vector<8x288xf32>
    %c0_37 = arith.constant 0 : index
    %c26 = arith.constant 26 : index
    %216 = vector.load %arg2[%c0_37, %c26] : memref<8x36xf32, #tpu.memory_space<vmem>>, vector<8x1xf32>
    %217 = vector.extract_strided_slice %203 {offsets = [2, 0], sizes = [1, 288], strides = [1, 1]} : vector<4x288xf32> to vector<1x288xf32>
    %218 = vector.broadcast %216 : vector<8x1xf32> to vector<8x288xf32>
    %219 = vector.broadcast %217 : vector<1x288xf32> to vector<8x288xf32>
    %220 = arith.mulf %218, %219 : vector<8x288xf32>
    %221 = arith.addf %215, %220 : vector<8x288xf32>
    %c0_38 = arith.constant 0 : index
    %c35 = arith.constant 35 : index
    %222 = vector.load %arg2[%c0_38, %c35] : memref<8x36xf32, #tpu.memory_space<vmem>>, vector<8x1xf32>
    %223 = vector.extract_strided_slice %203 {offsets = [3, 0], sizes = [1, 288], strides = [1, 1]} : vector<4x288xf32> to vector<1x288xf32>
    %224 = vector.broadcast %222 : vector<8x1xf32> to vector<8x288xf32>
    %225 = vector.broadcast %223 : vector<1x288xf32> to vector<8x288xf32>
    %226 = arith.mulf %224, %225 : vector<8x288xf32>
    %227 = arith.addf %221, %226 : vector<8x288xf32>
    %c0_39 = arith.constant 0 : index
    %c0_40 = arith.constant 0 : index
    %228 = vector.load %arg3[%c0_39, %c0_40] : memref<8x1xf32, #tpu.memory_space<vmem>>, vector<8x1xf32>
    %229 = vector.broadcast %228 : vector<8x1xf32> to vector<8x288xf32>
    %230 = arith.addf %227, %229 : vector<8x288xf32>
    %cst_41 = arith.constant 0.000000e+00 : f32
    %231 = vector.broadcast %cst_41 : f32 to vector<8x288xf32>
    %232 = arith.maximumf %230, %231 : vector<8x288xf32>
    %c0_42 = arith.constant 0 : index
    %c0_43 = arith.constant 0 : index
    %233 = vector.load %arg4[%c0_42, %c0_43] : memref<1x288xf32, #tpu.memory_space<vmem>>, vector<1x288xf32>
    %234 = vector.broadcast %233 : vector<1x288xf32> to vector<8x288xf32>
    %235 = arith.mulf %232, %234 : vector<8x288xf32>
    %cst_44 = arith.constant dense<0.000000e+00> : vector<8xf32>
    %236 = vector.multi_reduction <add>, %235, %cst_44 [1] : vector<8x288xf32> to vector<8xf32>
    %237 = vector.shape_cast %236 : vector<8xf32> to vector<8x1xf32>
    %c0_45 = arith.constant 0 : index
    %c0_46 = arith.constant 0 : index
    %238 = vector.load %arg5[%c0_45, %c0_46] : memref<8x10xf32, #tpu.memory_space<vmem>>, vector<8x10xf32>
    %239 = vector.broadcast %237 : vector<8x1xf32> to vector<8x10xf32>
    %240 = arith.mulf %239, %238 : vector<8x10xf32>
    %cst_47 = arith.constant dense<0.000000e+00> : vector<10xf32>
    %241 = vector.multi_reduction <add>, %240, %cst_47 [0] : vector<8x10xf32> to vector<10xf32>
    %242 = vector.shape_cast %241 : vector<10xf32> to vector<1x10xf32>
    %c0_48 = arith.constant 0 : index
    %c0_49 = arith.constant 0 : index
    %243 = vector.load %arg6[%c0_48, %c0_49] : memref<1x10xf32, #tpu.memory_space<vmem>>, vector<1x10xf32>
    %244 = arith.addf %242, %243 : vector<1x10xf32>
    %c0_50 = arith.constant 0 : index
    %c0_51 = arith.constant 0 : index
    %c0_52 = arith.constant 0 : index
    %245 = vector.load %arg7[%c0_50, %c0_51, %c0_52] : memref<1x1x10xf32, #tpu.memory_space<vmem>>, vector<1x1x10xf32>
    %246 = vector.shape_cast %245 : vector<1x1x10xf32> to vector<1x10xf32>
    %247 = vector.shape_cast %244 : vector<1x10xf32> to vector<1x1x10xf32>
    tpu.vector_store %arg7[%c0_50, %c0_51, %c0_52], %247 {strides = array<i32>} : memref<1x1x10xf32, #tpu.memory_space<vmem>>, vector<1x1x10xf32>,
    return
  }
  func.func @transform_0(%arg0: i32) -> (i32, i32, i32) {
    %c0_i32 = arith.constant 0 : i32
    %c0_i32_0 = arith.constant 0 : i32
    %c0_i32_1 = arith.constant 0 : i32
    return %arg0, %c0_i32, %c0_i32_0 : i32, i32, i32
  }
  func.func @transform_1(%arg0: i32) -> (i32, i32) {
    %c0_i32 = arith.constant 0 : i32
    %c0_i32_0 = arith.constant 0 : i32
    %c0_i32_1 = arith.constant 0 : i32
    return %c0_i32, %c0_i32_0 : i32, i32
  }
  func.func @transform_2(%arg0: i32) -> (i32, i32) {
    %c0_i32 = arith.constant 0 : i32
    %c0_i32_0 = arith.constant 0 : i32
    %c0_i32_1 = arith.constant 0 : i32
    return %c0_i32, %c0_i32_0 : i32, i32
  }
  func.func @transform_3(%arg0: i32) -> (i32, i32) {
    %c0_i32 = arith.constant 0 : i32
    %c0_i32_0 = arith.constant 0 : i32
    %c0_i32_1 = arith.constant 0 : i32
    return %c0_i32, %c0_i32_0 : i32, i32
  }
  func.func @transform_4(%arg0: i32) -> (i32, i32) {
    %c0_i32 = arith.constant 0 : i32
    %c0_i32_0 = arith.constant 0 : i32
    %c0_i32_1 = arith.constant 0 : i32
    return %c0_i32, %c0_i32_0 : i32, i32
  }
  func.func @transform_5(%arg0: i32) -> (i32, i32) {
    %c0_i32 = arith.constant 0 : i32
    %c0_i32_0 = arith.constant 0 : i32
    %c0_i32_1 = arith.constant 0 : i32
    return %c0_i32, %c0_i32_0 : i32, i32
  }
  func.func @transform_6(%arg0: i32) -> (i32, i32, i32) {
    %c0_i32 = arith.constant 0 : i32
    %c0_i32_0 = arith.constant 0 : i32
    %c0_i32_1 = arith.constant 0 : i32
    return %arg0, %c0_i32, %c0_i32_0 : i32, i32, i32
  }
}

</mosaic_0001>

<bundles_post_ra>
// kernel: vision_module_forward.1
= control target key start
LH: loop header
LB: loop body
LE: loop exit
PB: predicated region body
PF: predicated region fallthrough
CT: control target
= control target key end

     0   :  { %11 = vsyncpa [#allocation3], 0  ;;  %s2148_s0 = inlined_call_operand.vmem [shape: f32[2,4,384], index: 0, kind: input, shape index: {}]   ;;  %s2149_s1 = inlined_call_operand.vmem [shape: f32[8,36], index: 1, kind: input, shape index: {}]   ;;  %s2150_s2 = inlined_call_operand.vmem [shape: f32[8,1], index: 2, kind: input, shape index: {}]   ;;  %s2151_s3 = inlined_call_operand.vmem [shape: f32[1,288], index: 3, kind: input, shape index: {}]   ;;  %s2152_s4 = inlined_call_operand.vmem [shape: f32[8,10], index: 4, kind: input, shape index: {}]   ;;  %s2153_s5 = inlined_call_operand.vmem [shape: f32[1,10], index: 5, kind: input, shape index: {}]   ;;  %s2154_s6 = inlined_call_operand.hbm [shape: f32[2,1,10], index: 6, kind: output, shape index: {}]  }
   0x1   :  { %13 = vsyncpa [#allocation3 + $0x1], 0  ;;  %s1571_s21 = smov 0   ;;  %s1573_s22 = smov 0  }
   0x2   :  { %s1575_s23 = smov 0   ;;  %s1577_s24 = smov 0  }
   0x3 LB: > { %s1592_s25 = sadd.s32 4294967295, %s1489_s24   ;;  %s1299_s26 = sadd.s32 4294967294, %s1489_s24   ;;  %s1489_s24 = sphi %s1577_s24, %s2160_s24   ;;  %s1485_s23 = sphi %s1575_s23, %s2159_s23   ;;  %s1481_s22 = sphi %s1573_s22, %s2158_s22   ;;  %s1477_s21 = sphi %s1571_s21, %s2157_s21  }
   0x4   : > { %s1596_s27 = sadd.s32 1, %s1489_s24   ;;  %s157_s28 = sadd.s32 1, %s1485_s23 }
   0x5   : > { %s154_s29 = ssub.s32 %s1489_s24, %s1596_s27  ;;  %p167_p0 = scmp.ne.s32.totalorder %s1485_s23, %s1481_s22 }
   0x6   : > { %p155_p1 = scmp.eq.s32.totalorder %s154_s29, 0  ;;  %p168_p2 = scmp.eq.s32.totalorder %s1592_s25, 1 }
   0x7   : > { %p173_p3 = scmp.ne.s32.totalorder %s1481_s22, %s1477_s21  ;;  %p174_p4 = scmp.eq.s32.totalorder %s1299_s26, 1 }
   0x8   : > { %s1607_s30 = scalar_select %p155_p1, %s1485_s23, %s157_s28  }
   0x9   : > { %p1609_p5 = por %p168_p2, %p167_p0  ;;  %p1613_p6 = por %p174_p4, %p173_p3 }
   0xa   : > { %p1302_p7 = scmp.ge.s32.totalorder %s1489_s24, 1  ;;  %p215_p8 = scmp.lt.s32.totalorder %s1489_s24, 3 }
   0xc   : > { %p216_p9 = pnand %p1302_p7, %p215_p8 }
   0xd   : > { %v1622_v0 = vld [vmem:[%s2149_s1] sm:$0xff] (!%p216_p9)  ;;  %v1491_v1 = vmov (!%p216_p9), 18   ;;  %v1492_v2 = vmov (!%p216_p9), 9   ;;  %v1493_v3 = vmov (!%p216_p9), 27   ;;  %v1494_v4 = vmov (!%p216_p9), 29   ;;  %p244_p10 = scmp.lt.s32.totalorder (!%p216_p9), %s1592_s25, 1 }
   0xe   : > { %219 = sbr.rel (%p216_p9) target bundleno = 665 (0x299), region = 44  ;;  %1392 = vset.pattern.permute.xlu1 (!%p216_p9), %v1491_v1  ;;  %1391 = vset.pattern.permute.xlu0 (!%p216_p9), %v1492_v2  ;;  %v1495_v5 = vmov (!%p216_p9), 1   ;;  %v1496_v6 = vmov (!%p216_p9), 21   ;;  %v1497_v7 = vmov (!%p216_p9), 10   ;;  %v1498_v8 = vmov (!%p216_p9), 13   ;;  %s1527_s16 = smov (!%p216_p9), 127  }
   0xf   : > { %330 = vperm.xlu1 (!%p216_p9), %1392, %v1622_v0   ;;  %293 = vperm.xlu0 (!%p216_p9), %1391, %v1622_v0   ;;  %v1499_v9 = vmov (!%p216_p9), 19   ;;  %v1500_v10 = vmov (!%p216_p9), 5   ;;  %v1501_v11 = vmov (!%p216_p9), 28   ;;  %v1502_v12 = vmov (!%p216_p9), 32   ;;  %s1528_s17 = smov (!%p216_p9), 126   ;;  %s1529_s18 = smov (!%p216_p9), 110  }
  0x10   : > { %v1503_v13 = vmov (!%p216_p9), 2   ;;  %v1504_v14 = vmov (!%p216_p9), 24   ;;  %v1505_v15 = vmov (!%p216_p9), 11   ;;  %v1506_v16 = vmov (!%p216_p9), 16   ;;  %s1530_s19 = smov (!%p216_p9), 109   ;;  %s1531_s20 = smov (!%p216_p9), 108  }
  0x11   : > { %v1507_v17 = vmov (!%p216_p9), 20   ;;  %v1508_v18 = vmov (!%p216_p9), 8   ;;  %v1509_v19 = vmov (!%p216_p9), 35   ;;  %v1510_v20 = vmov (!%p216_p9), 3   ;;  %s1532_s26 = smov (!%p216_p9), 92   ;;  %s1533_s28 = smov (!%p216_p9), 91  }
  0x12   : > { %v1511_v21 = vmov (!%p216_p9), 0   ;;  %v1512_v22 = vmov (!%p216_p9), 12   ;;  %v1513_v23 = vmov (!%p216_p9), 30   ;;  %v1514_v24 = vmov (!%p216_p9), 4   ;;  %s1534_s29 = smov (!%p216_p9), 90  }
  0x13   : > { %1393 = vset.pattern.permute.xlu1 (!%p216_p9), %v1493_v3  ;;  %1401 = vset.pattern.permute.xlu0 (!%p216_p9), %v1494_v4  ;;  %v1515_v25 = vmov (!%p216_p9), 22   ;;  %v1516_v26 = vmov (!%p216_p9), 31   ;;  %v1517_v27 = vmov (!%p216_p9), 14   ;;  %v1518_v28 = vmov (!%p216_p9), 23  }
  0x14   : > { %367 = vperm.xlu1 (!%p216_p9), %1393, %v1622_v0   ;;  %574 = vperm.xlu0 (!%p216_p9), %1401, %v1622_v0   ;;  %v1519_v29 = vmov (!%p216_p9), 6   ;;  %v1520_v30 = vmov (!%p216_p9), 15   ;;  %v1521_v31 = vmov (!%p216_p9), 33   ;;  %v1522_v32 = vmov (!%p216_p9), 7  }
  0x15   : > { %v1523_v33 = vmov 25   ;;  %v1524_v34 = vmov 34   ;;  %v1525_v35 = vmov 17   ;;  %s245_s11 = scalar_select %p244_p10, %s1592_s25, 1  ;;  %v1526_v36 = vmov 26  }
  0x16   : > { %v259_v37 = vlaneseq  ;;  %vm419_vm0 = vcmask 1039360   ;;  %vm516_vm1 = vcmask 1031168   ;;  %vm613_vm2 = vcmask 900096  }
  0x17   : > { %s1307_s12 = smul.u32 12, %s245_s11  ;;  %vm710_vm3 = vcmask 891904   ;;  %vm807_vm4 = vcmask 883712   ;;  %vm904_vm5 = vcmask 752640   ;;  %vm1001_vm6 = vcmask 744448  }
  0x18   : > { %1394 = vset.pattern.permute.xlu1 %v1495_v5  ;;  %1404 = vset.pattern.permute.xlu0 %v1496_v6  ;;  %v260_v38 = vshrl.u32 %v259_v37, 7  ;;  %vm1098_vm7 = vcmask 736256   ;;  %vm1212_vm8 = vcmask 261120   ;;  %vm1219_vm9 = vcmask 80896  }
  0x19   : > { %404 = vperm.xlu1 %1394, %v1622_v0   ;;  %647 = vperm.xlu0 %1404, %v1622_v0   ;;  %s248_s15 = scalar_lea.vmem %s2148_s0, %s1307_s12  ;;  %vm1229_vm10 = vcmask 73728  }
  0x1a   : > { %v1665_v39 = vsub.s32 0, %v260_v38  ;;  %v265_v40 = vsub.s32 4, %v260_v38  ;;  %v249_v42 = vld [vmem:[%s248_s15] sm:$0xff]  ;;  %v302_v45 = vsub.s32 5, %v260_v38  ;;  %v1672_v47 = vsub.s32 1, %v260_v38 }
  0x1b   : > { %v250_v48 = vld [vmem:[%s248_s15 + $0x8] sm:$0xf]  ;;  %v339_v55 = vsub.s32 6, %v260_v38  ;;  %v1695_v61 = vsub.s32 2, %v260_v38  ;;  %v376_v2 = vsub.s32 7, %v260_v38  ;;  %s242_s15 = sand.u32 1, %s1481_s22  }
  0x1c   : > { %v266_v43 = vrot.slane %v249_v42, %v265_v40  ;;  %v262_v44 = vrot.slane %v249_v42, %v1665_v39  ;;  %v270_v51 = vrot.slane %v250_v48, %v1665_v39  ;;  %v303_v52 = vrot.slane %v249_v42, %v302_v45  ;;  %s1232_s9 = scalar_lea.sflag [#allocation3], %s242_s15 }
  0x1d   : > { %1395 = vset.pattern.permute.xlu1 %v1497_v7  ;;  %1407 = vset.pattern.permute.xlu0 %v1498_v8  ;;  %v299_v53 = vrot.slane %v249_v42, %v1672_v47  ;;  %v340_v62 = vrot.slane %v249_v42, %v339_v55  ;;  %v307_v63 = vrot.slane %v250_v48, %v1672_v47 }
  0x1e   : > { %429 = vperm.xlu1 %1395, %v1622_v0   ;;  %720 = vperm.xlu0 %1407, %v1622_v0   ;;  %v1675_v49 = vrot.slane %v266_v43, %v1665_v39  ;;  %v1678_v50 = vrot.slane %v262_v44, %v1665_v39  ;;  %v1685_v58 = vrot.slane %v270_v51, %v1665_v39 }
  0x1f   : > { %v1688_v59 = vrot.slane %v303_v52, %v1672_v47  ;;  %v1691_v60 = vrot.slane %v299_v53, %v1672_v47  ;;  %v336_v5 = vrot.slane %v249_v42, %v1695_v61  ;;  %v1705_v6 = vrot.slane %v340_v62, %v1695_v61 }
  0x20   : > { %v1708_v7 = vrot.slane %v307_v63, %v1672_v47  ;;  %v377_v8 = vrot.slane %v249_v42, %v376_v2 }
  0x22   : > { %1396 = vset.pattern.permute.xlu1 %v1499_v9  ;;  %1410 = vset.pattern.permute.xlu0 %v1500_v10 }
  0x23   : > { %453 = vperm.xlu1 %1396, %v1622_v0   ;;  %792 = vperm.xlu0 %1410, %v1622_v0  }
  0x27   : > { %1397 = vset.pattern.permute.xlu1 %v1501_v11  ;;  %1413 = vset.pattern.permute.xlu0 %v1502_v12  ;;  %v372_v11 = vsub.s32 3, %v260_v38  ;;  %v1713_v12 = vrot.slane %v336_v5, %v1695_v61 }
  0x28   : > { %477 = vperm.xlu1 %1397, %v1622_v0   ;;  %865 = vperm.xlu0 %1413, %v1622_v0  }
  0x2c   : > { %1398 = vset.pattern.permute.xlu1 %v1503_v13  ;;  %1416 = vset.pattern.permute.xlu0 %v1504_v14  ;;  %v1717_v14 = vrot.slane %v377_v8, %v372_v11 }
  0x2d   : > { %501 = vperm.xlu1 %1398, %v1622_v0   ;;  %938 = vperm.xlu0 %1416, %v1622_v0  }
  0x31   : > { %1399 = vset.pattern.permute.xlu1 %v1505_v15  ;;  %1419 = vset.pattern.permute.xlu0 %v1506_v16  ;;  %v344_v15 = vrot.slane %v250_v48, %v1695_v61 }
  0x32   : > { %526 = vperm.xlu1 %1399, %v1622_v0   ;;  %1011 = vperm.xlu0 %1419, %v1622_v0  }
  0x36   : > { %1400 = vset.pattern.permute.xlu1 %v1507_v17  ;;  %1422 = vset.pattern.permute.xlu0 %v1508_v18 }
  0x37   : > { %550 = vperm.xlu1 %1400, %v1622_v0   ;;  %1083 = vperm.xlu0 %1422, %v1622_v0  }
  0x3b   : > { %1425 = vset.pattern.permute.xlu0 %v1509_v19  ;;  %1402 = vset.pattern.permute.xlu1 %v1510_v20  ;;  %v373_v19 = vrot.slane %v249_v42, %v372_v11  ;;  %v1725_v20 = vrot.slane %v344_v15, %v1695_v61 }
  0x3c   : > { %1156 = vperm.xlu0 %1425, %v1622_v0   ;;  %598 = vperm.xlu1 %1402, %v1622_v0  }
  0x40   : > { %1426 = vset.pattern.permute.xlu0 %v1511_v21  ;;  %1403 = vset.pattern.permute.xlu1 %v1512_v22  ;;  %v1728_v22 = vrot.slane %v373_v19, %v372_v11 }
  0x41   : > { %254 = vperm.xlu0 %1426, %v1622_v0   ;;  %623 = vperm.xlu1 %1403, %v1622_v0  }
  0x45   : > { %1405 = vset.pattern.permute.xlu1 %v1513_v23 }
  0x46   : > { %671 = vperm.xlu1 %1405, %v1622_v0  }
  0x4a   : > { %1406 = vset.pattern.permute.xlu1 %v1514_v24 }
  0x4b   : > { %695 = vperm.xlu1 %1406, %v1622_v0  }
  0x4f   : > { %1408 = vset.pattern.permute.xlu1 %v1515_v25  ;;  %v381_v25 = vrot.slane %v250_v48, %v372_v11 }
  0x50   : > { %744 = vperm.xlu1 %1408, %v1622_v0  }
  0x54   : > { %1409 = vset.pattern.permute.xlu1 %v1516_v26 }
  0x55   : > { %768 = vperm.xlu1 %1409, %v1622_v0  }
  0x59   : > { %1411 = vset.pattern.permute.xlu1 %v1517_v27 }
  0x5a   : > { %817 = vperm.xlu1 %1411, %v1622_v0  }
  0x5e   : > { %1412 = vset.pattern.permute.xlu1 %v1518_v28 }
  0x5f   : > { %841 = vperm.xlu1 %1412, %v1622_v0  }
  0x63   : > { %1414 = vset.pattern.permute.xlu1 %v1519_v29  ;;  %v1736_v29 = vrot.slane %v381_v25, %v372_v11 }
  0x64   : > { %889 = vperm.xlu1 %1414, %v1622_v0  }
  0x68   : > { %1415 = vset.pattern.permute.xlu1 %v1520_v30 }
  0x69   : > { %914 = vperm.xlu1 %1415, %v1622_v0  }
  0x6d   : > { %1417 = vset.pattern.permute.xlu1 %v1521_v31 }
  0x6e   : > { %962 = vperm.xlu1 %1417, %v1622_v0  }
  0x72   : > { %1418 = vset.pattern.permute.xlu1 %v1522_v32 }
  0x73   : > { %986 = vperm.xlu1 %1418, %v1622_v0  }
  0x77   : > { %1420 = vset.pattern.permute.xlu1 %v1523_v33 }
  0x78   : > { %1035 = vperm.xlu1 %1420, %v1622_v0  }
  0x7c   : > { %1421 = vset.pattern.permute.xlu1 %v1524_v34 }
  0x7d   : > { %1059 = vperm.xlu1 %1421, %v1622_v0  }
  0x81   : > { %1423 = vset.pattern.permute.xlu1 %v1525_v35 }
  0x82   : > { %1108 = vperm.xlu1 %1423, %v1622_v0  }
  0x86   : > { %1424 = vset.pattern.permute.xlu1 %v1526_v36 }
  0x87   : > { %1132 = vperm.xlu1 %1424, %v1622_v0  }
  0x8e   : > { %v1667_v41 = vpop.permute.xlu1 %330  ;;  %v1741_v31 = vpop.permute.xlu0 %293 }
  0x93   : > { %v1670_v46 = vpop.permute.xlu1 %367  ;;  %v575_v37 = vpop.permute.xlu0 %574 }
  0x94   : > { %v577_v40 = vmul.f32 %v575_v37, %v1728_v22  ;;  %v579_v43 = vmul.f32 %v575_v37, %v1736_v29  ;;  %v578_v55 = vmul.f32 %v575_v37, %v1717_v14 }
  0x98   : > { %v405_v54 = vpop.permute.xlu1 %404  ;;  %v648_v63 = vpop.permute.xlu0 %647 }
  0x99   : > { %v408_v56 = vmul.f32 %v405_v54, %v1675_v49  ;;  %v407_v57 = vmul.f32 %v405_v54, %v1678_v50  ;;  %v409_v0 = vmul.f32 %v405_v54, %v1685_v58 }
  0x9b   : > { %415 = vrot.lane.b32.xlu1 %v408_v56, %s1527_s16  ;;  %413 = vrot.lane.b32.xlu0 %v407_v57, %s1527_s16 }
  0x9d   : > { %v430_v1 = vpop.permute.xlu1 %429 }
  0x9e   : > { %v433_v3 = vmul.f32 %v430_v1, %v1688_v59  ;;  %v432_v4 = vmul.f32 %v430_v1, %v1691_v60  ;;  %v434_v13 = vmul.f32 %v430_v1, %v1708_v7 }
  0x9f   : > { %417 = vrot.lane.b32.xlu0 %v409_v0, %s1527_s16  ;;  %v651_v0 = vmul.f32 %v648_v63, %v1705_v6 }
  0xa0   : > { %440 = vrot.lane.b32.xlu1 %v433_v3, %s1527_s16 }
  0xa2   : > { %v454_v9 = vpop.permute.xlu1 %453 }
  0xa3   : > { %438 = vrot.lane.b32.xlu0 %v432_v4, %s1527_s16  ;;  %v457_v10 = vmul.f32 %v454_v9, %v1705_v6  ;;  %v456_v17 = vmul.f32 %v454_v9, %v1713_v12  ;;  %v458_v23 = vmul.f32 %v454_v9, %v1725_v20  ;;  %v721_v9 = vpop.permute.xlu0 %720 }
  0xa5   : > { %464 = vrot.lane.b32.xlu1 %v457_v10, %s1527_s16  ;;  %v650_v10 = vmul.f32 %v648_v63, %v1713_v12 }
  0xa7   : > { %442 = vrot.lane.b32.xlu0 %v434_v13, %s1527_s16  ;;  %v478_v16 = vpop.permute.xlu1 %477  ;;  %v793_v15 = vpop.permute.xlu0 %792 }
  0xa8   : > { %v481_v18 = vmul.f32 %v478_v16, %v1717_v14  ;;  %v480_v26 = vmul.f32 %v478_v16, %v1728_v22  ;;  %v482_v30 = vmul.f32 %v478_v16, %v1736_v29  ;;  %v652_v16 = vmul.f32 %v648_v63, %v1725_v20 }
  0xaa   : > { %488 = vrot.lane.b32.xlu1 %v481_v18, %s1527_s16 }
  0xab   : > { %462 = vrot.lane.b32.xlu0 %v456_v17, %s1527_s16  ;;  %v723_v17 = vmul.f32 %v721_v9, %v1691_v60 }
  0xac   : > { %v502_v21 = vpop.permute.xlu1 %501 }
  0xad   : > { %v505_v24 = vmul.f32 %v502_v21, %v1675_v49  ;;  %v504_v34 = vmul.f32 %v502_v21, %v1678_v50  ;;  %v506_v38 = vmul.f32 %v502_v21, %v1685_v58  ;;  %v725_v21 = vmul.f32 %v721_v9, %v1708_v7 }
  0xaf   : > { %466 = vrot.lane.b32.xlu0 %v458_v23, %s1527_s16  ;;  %512 = vrot.lane.b32.xlu1 %v505_v24, %s1528_s17  ;;  %v1798_v23 = vpop.permute.xlu0 %865 }
  0xb0   : > { %v868_v63 = vmul.f32 %v1798_v23, %v1728_v22 }
  0xb1   : > { %v527_v27 = vpop.permute.xlu1 %526 }
  0xb2   : > { %v530_v28 = vmul.f32 %v527_v27, %v1688_v59  ;;  %v529_v42 = vmul.f32 %v527_v27, %v1691_v60  ;;  %v531_v45 = vmul.f32 %v527_v27, %v1708_v7 }
  0xb3   : > { %486 = vrot.lane.b32.xlu0 %v480_v26, %s1527_s16  ;;  %v1807_v27 = vpop.permute.xlu0 %938 }
  0xb4   : > { %537 = vrot.lane.b32.xlu1 %v530_v28, %s1528_s17 }
  0xb6   : > { %v551_v32 = vpop.permute.xlu1 %550 }
  0xb7   : > { %490 = vrot.lane.b32.xlu0 %v482_v30, %s1527_s16  ;;  %v553_v33 = vmul.f32 %v551_v32, %v1713_v12  ;;  %v554_v35 = vmul.f32 %v551_v32, %v1705_v6  ;;  %v555_v52 = vmul.f32 %v551_v32, %v1725_v20 }
  0xb9   : > { %559 = vrot.lane.b32.xlu1 %v553_v33, %s1528_s17  ;;  %v724_v33 = vmul.f32 %v721_v9, %v1688_v59 }
  0xbb   : > { %510 = vrot.lane.b32.xlu0 %v504_v34, %s1528_s17  ;;  %v599_v36 = vpop.permute.xlu1 %598  ;;  %v1817_v34 = vpop.permute.xlu0 %1011 }
  0xbc   : > { %v602_v48 = vmul.f32 %v599_v36, %v1675_v49  ;;  %v601_v57 = vmul.f32 %v599_v36, %v1678_v50  ;;  %v603_v2 = vmul.f32 %v599_v36, %v1685_v58 }
  0xbd   : > { %561 = vrot.lane.b32.xlu1 %v554_v35, %s1528_s17 }
  0xbf   : > { %514 = vrot.lane.b32.xlu0 %v506_v38, %s1528_s17  ;;  %v796_v38 = vmul.f32 %v793_v15, %v1675_v49 }
  0xc0   : > { %v624_v44 = vpop.permute.xlu1 %623 }
  0xc1   : > { %583 = vrot.lane.b32.xlu1 %v577_v40, %s1528_s17  ;;  %v626_v53 = vmul.f32 %v624_v44, %v1691_v60  ;;  %v628_v56 = vmul.f32 %v624_v44, %v1708_v7  ;;  %v627_v4 = vmul.f32 %v624_v44, %v1688_v59 }
  0xc3   : > { %535 = vrot.lane.b32.xlu0 %v529_v42, %s1528_s17  ;;  %v1829_v42 = vpop.permute.xlu0 %1083 }
  0xc5   : > { %587 = vrot.lane.b32.xlu1 %v579_v43, %s1528_s17  ;;  %v672_v51 = vpop.permute.xlu1 %671 }
  0xc6   : > { %v674_v3 = vmul.f32 %v672_v51, %v1728_v22  ;;  %v676_v5 = vmul.f32 %v672_v51, %v1736_v29  ;;  %v675_v19 = vmul.f32 %v672_v51, %v1717_v14 }
  0xc7   : > { %539 = vrot.lane.b32.xlu0 %v531_v45, %s1528_s17  ;;  %v1840_v51 = vpop.permute.xlu0 %1156 }
  0xc9   : > { %609 = vrot.lane.b32.xlu1 %v602_v48, %s1529_s18 }
  0xca   : > { %v696_v54 = vpop.permute.xlu1 %695 }
  0xcb   : > { %563 = vrot.lane.b32.xlu0 %v555_v52, %s1528_s17  ;;  %v699_v11 = vmul.f32 %v696_v54, %v1675_v49  ;;  %v698_v25 = vmul.f32 %v696_v54, %v1678_v50  ;;  %v700_v28 = vmul.f32 %v696_v54, %v1685_v58 }
  0xcd   : > { %632 = vrot.lane.b32.xlu1 %v626_v53, %s1529_s18  ;;  %v795_v53 = vmul.f32 %v793_v15, %v1678_v50 }
  0xcf   : > { %585 = vrot.lane.b32.xlu0 %v578_v55, %s1528_s17  ;;  %v745_v62 = vpop.permute.xlu1 %744 }
  0xd0   : > { %v748_v26 = vmul.f32 %v745_v62, %v1705_v6  ;;  %v747_v37 = vmul.f32 %v745_v62, %v1713_v12  ;;  %v749_v43 = vmul.f32 %v745_v62, %v1725_v20  ;;  %v323_v62 = vmul.f32 %v1691_v60, %v1741_v31 }
  0xd1   : > { %636 = vrot.lane.b32.xlu1 %v628_v56, %s1529_s18  ;;  %v255_v56 = vpop.permute.xlu0 %254 }
  0xd3   : > { %607 = vrot.lane.b32.xlu0 %v601_v57, %s1529_s18  ;;  %v797_v57 = vmul.f32 %v793_v15, %v1685_v58 }
  0xd4   : > { %v769_v1 = vpop.permute.xlu1 %768 }
  0xd5   : > { %658 = vrot.lane.b32.xlu1 %v651_v0, %s1529_s18  ;;  %v771_v30 = vmul.f32 %v769_v1, %v1728_v22  ;;  %v773_v36 = vmul.f32 %v769_v1, %v1736_v29  ;;  %v772_v45 = vmul.f32 %v769_v1, %v1717_v14  ;;  %v286_v0 = vmul.f32 %v1678_v50, %v255_v56 }
  0xd7   : > { %611 = vrot.lane.b32.xlu0 %v603_v2, %s1529_s18  ;;  %v326_v9 = vadd.f32 %v323_v62, %v286_v0 }
  0xd9   : > { %680 = vrot.lane.b32.xlu1 %v674_v3, %s1529_s18  ;;  %v1780_v8 = vpop.permute.xlu1 %817  ;;  %v324_v3 = vmul.f32 %v1688_v59, %v1741_v31 }
  0xda   : > { %v820_v44 = vmul.f32 %v1780_v8, %v1691_v60  ;;  %v822_v52 = vmul.f32 %v1780_v8, %v1708_v7  ;;  %v821_v2 = vmul.f32 %v1780_v8, %v1688_v59 }
  0xdb   : > { %634 = vrot.lane.b32.xlu0 %v627_v4, %s1529_s18  ;;  %v870_v4 = vmul.f32 %v1798_v23, %v1736_v29 }
  0xdd   : > { %684 = vrot.lane.b32.xlu1 %v676_v5, %s1529_s18  ;;  %v287_v5 = vmul.f32 %v1675_v49, %v255_v56 }
  0xde   : > { %v1786_v13 = vpop.permute.xlu1 %841 }
  0xdf   : > { %656 = vrot.lane.b32.xlu0 %v650_v10, %s1529_s18  ;;  %v845_v54 = vmul.f32 %v1786_v13, %v1705_v6  ;;  %v360_v10 = vmul.f32 %v1713_v12, %v1667_v41  ;;  %v844_v8 = vmul.f32 %v1786_v13, %v1713_v12  ;;  %v327_v15 = vadd.f32 %v324_v3, %v287_v5 }
  0xe0   : > { %v399_v5 = vmul.f32 %v1736_v29, %v1670_v46 }
  0xe1   : > { %706 = vrot.lane.b32.xlu1 %v699_v11, %s1530_s19 }
  0xe3   : > { %660 = vrot.lane.b32.xlu0 %v652_v16, %s1529_s18  ;;  %v1793_v18 = vpop.permute.xlu1 %889 }
  0xe4   : > { %v893_v16 = vmul.f32 %v1793_v18, %v1675_v49 }
  0xe5   : > { %729 = vrot.lane.b32.xlu1 %v723_v17, %s1530_s19 }
  0xe7   : > { %682 = vrot.lane.b32.xlu0 %v675_v19, %s1529_s18  ;;  %v363_v19 = vadd.f32 %v360_v10, %v326_v9  ;;  %v942_v10 = vmul.f32 %v1807_v27, %v1705_v6  ;;  %s1304_s18 = sshll.u32 %s1592_s25, 4  ;;  %s1535_s25 = smov [#allocation2]  }
  0xe8   : > { %v1801_v24 = vpop.permute.xlu1 %914  ;;  %s1431_s11 = sshll.u32 %s1535_s25, 4  ;;  %s1432_s11 = int_to_ptr.vmem [resolvable:$false] %s1431_s11 }
  0xe9   : > { %733 = vrot.lane.b32.xlu1 %v725_v21, %s1530_s19  ;;  %v325_v21 = vmul.f32 %v1708_v7, %v1741_v31  ;;  %v917_v31 = vmul.f32 %v1801_v24, %v1691_v60  ;;  %v919_v62 = vmul.f32 %v1801_v24, %v1708_v7  ;;  %s1433_s12 = scalar_lea.vmem %s1432_s11, 32 }
  0xeb   : > { %704 = vrot.lane.b32.xlu0 %v698_v25, %s1530_s19  ;;  %v288_v25 = vmul.f32 %v1685_v58, %v255_v56 }
  0xed   : > { %755 = vrot.lane.b32.xlu1 %v748_v26, %s1530_s19  ;;  %v1812_v32 = vpop.permute.xlu1 %962  ;;  %v361_v26 = vmul.f32 %v1705_v6, %v1667_v41 }
  0xef   : > { %708 = vrot.lane.b32.xlu0 %v700_v28, %s1530_s19  ;;  %v397_v28 = vmul.f32 %v1728_v22, %v1670_v46 }
  0xf1   : > { %777 = vrot.lane.b32.xlu1 %v771_v30, %s1530_s19 }
  0xf2   : > { %v1819_v35 = vpop.permute.xlu1 %986 }
  0xf3   : > { %731 = vrot.lane.b32.xlu0 %v724_v33, %s1530_s19  ;;  %v846_v33 = vmul.f32 %v1786_v13, %v1725_v20  ;;  %v869_v13 = vmul.f32 %v1798_v23, %v1717_v14 }
  0xf5   : > { %781 = vrot.lane.b32.xlu1 %v773_v36, %s1530_s19 }
  0xf7   : > { %753 = vrot.lane.b32.xlu0 %v747_v37, %s1530_s19  ;;  %v1827_v40 = vpop.permute.xlu1 %1035  ;;  %v364_v37 = vadd.f32 %v361_v26, %v327_v15 }
  0xf9   : > { %803 = vrot.lane.b32.xlu1 %v796_v38, %s1531_s20  ;;  %v400_v38 = vadd.f32 %v397_v28, %v363_v19 }
  0xfb   : > { %757 = vrot.lane.b32.xlu0 %v749_v43, %s1530_s19 }
  0xfc   : > { %v1838_v48 = vpop.permute.xlu1 %1059 }
  0xfd   : > { %826 = vrot.lane.b32.xlu1 %v820_v44, %s1531_s20  ;;  %v328_v44 = vadd.f32 %v325_v21, %v288_v25 }
  0xff   : > { %779 = vrot.lane.b32.xlu0 %v772_v45, %s1530_s19  ;;  %v398_v45 = vmul.f32 %v1717_v14, %v1670_v46  ;;  %v965_v46 = vmul.f32 %v1812_v32, %v1728_v22  ;;  %s243_s19 = scalar_lea.vmem [#allocation2], %s242_s15 }
 0x101   : > { %830 = vrot.lane.b32.xlu1 %v822_v52, %s1531_s20  ;;  %v1850_v55 = vpop.permute.xlu1 %1108 }
 0x103   : > { %801 = vrot.lane.b32.xlu0 %v795_v53, %s1531_s20 }
 0x105   : > { %852 = vrot.lane.b32.xlu1 %v845_v54, %s1531_s20  ;;  %v362_v54 = vmul.f32 %v1725_v20, %v1667_v41  ;;  %v892_v41 = vmul.f32 %v1793_v18, %v1678_v50 }
 0x106   : > { %v1860_v1 = vpop.permute.xlu1 %1132 }
 0x107   : > { %805 = vrot.lane.b32.xlu0 %v797_v57, %s1531_s20  ;;  %v365_v3 = vadd.f32 %v362_v54, %v328_v44 }
 0x109   : > { %874 = vrot.lane.b32.xlu1 %v868_v63, %s1531_s20  ;;  %v401_v63 = vadd.f32 %v398_v45, %v364_v37 }
 0x10b   : > { %828 = vrot.lane.b32.xlu0 %v821_v2, %s1531_s20 }
 0x10d   : > { %878 = vrot.lane.b32.xlu1 %v870_v4, %s1531_s20  ;;  %v414_v11 = vpop.permute.xlu0 %413  ;;  %v416_v17 = vpop.permute.xlu1 %415 }
 0x10e   : > { %v420_v36 = vsel %vm419_vm0, %v414_v11, %v416_v17 }
 0x10f   : > { %850 = vrot.lane.b32.xlu0 %v844_v8, %s1531_s20  ;;  %v425_v52 = vadd.f32 %v420_v36, %v400_v38  ;;  %v402_v8 = vadd.f32 %v399_v5, %v365_v3  ;;  %v918_v36 = vmul.f32 %v1801_v24, %v1688_v59  ;;  %v990_v24 = vmul.f32 %v1819_v35, %v1675_v49 }
 0x110   : > { %v989_v5 = vmul.f32 %v1819_v35, %v1678_v50 }
 0x111   : > { %900 = vrot.lane.b32.xlu1 %v893_v16, %s1532_s26  ;;  %v418_v30 = vpop.permute.xlu0 %417 }
 0x112   : > { %v441_v43 = vpop.permute.xlu1 %440  ;;  %v421_v56 = vsel %vm419_vm0, %v416_v17, %v418_v30  ;;  %v894_v17 = vmul.f32 %v1793_v18, %v1685_v58  ;;  %v427_v19 = vadd.f32 %v418_v30, %v402_v8  ;;  %v967_v30 = vmul.f32 %v1812_v32, %v1736_v29 }
 0x113   : > { %854 = vrot.lane.b32.xlu0 %v846_v33, %s1531_s20  ;;  %v426_v4 = vadd.f32 %v421_v56, %v401_v63 }
 0x115   : > { %923 = vrot.lane.b32.xlu1 %v917_v31, %s1532_s26  ;;  %v439_v53 = vpop.permute.xlu0 %438 }
 0x116   : > { %v444_v57 = vsel %vm419_vm0, %v439_v53, %v441_v43 }
 0x117   : > { %v449_v0 = vadd.f32 %v444_v57, %v425_v52  ;;  %876 = vrot.lane.b32.xlu0 %v869_v13, %s1531_s20  ;;  %v465_v2 = vpop.permute.xlu1 %464  ;;  %v943_v13 = vmul.f32 %v1807_v27, %v1725_v20  ;;  %v1014_v57 = vmul.f32 %v1817_v34, %v1691_v60  ;;  %s1244_s20 = sshll.u32 %s243_s19, 4  ;;  %s2108_s20 = int_to_ptr.vmem [resolvable:$true] %s1244_s20 }
 0x118   : > { %s1427_s10 = scalar_lea.vmem %s2108_s20, 16  ;;  %p1434_p0 = scmp.lt.s32.totalorder %s2108_s20, %s1432_s11 }
 0x119   : > { %927 = vrot.lane.b32.xlu1 %v919_v62, %s1532_s26  ;;  %v443_v23 = vpop.permute.xlu0 %442  ;;  %p1428_p11 = scmp.ne.s32.totalorder %s2108_s20, %s1427_s10  ;;  %p1435_p1 = scmp.lt.s32.totalorder %s1433_s12, %s1427_s10 }
 0x11a   : > { %v445_v9 = vsel %vm419_vm0, %v441_v43, %v443_v23  ;;  %v451_v26 = vadd.f32 %v443_v23, %v427_v19  ;;  %v941_v43 = vmul.f32 %v1807_v27, %v1713_v12  ;;  %v1016_v27 = vmul.f32 %v1817_v34, %v1708_v7 }
 0x11b   : > { %v450_v11 = vadd.f32 %v445_v9, %v426_v4  ;;  %898 = vrot.lane.b32.xlu0 %v892_v41, %s1532_s26  ;;  %p1429_p12 = pnand %p1428_p11, %p1609_p5  ;;  %p1436_p2 = por %p1435_p1, %p1434_p0 }
 0x11c   : > { %v489_v15 = vpop.permute.xlu1 %488 }
 0x11d   : > { %949 = vrot.lane.b32.xlu1 %v942_v10, %s1532_s26  ;;  %v463_v16 = vpop.permute.xlu0 %462  ;;  %p1430_p13 = pneg %p1429_p12 }
 0x11e   : > { %v468_v21 = vsel %vm419_vm0, %v463_v16, %v465_v2  ;;  %v991_v16 = vmul.f32 %v1819_v35, %v1685_v58 }
 0x11f   : > { %v473_v25 = vadd.f32 %v468_v21, %v449_v0  ;;  %902 = vrot.lane.b32.xlu0 %v894_v17, %s1532_s26  ;;  %v1062_v21 = vmul.f32 %v1838_v48, %v1728_v22  ;;  %p1437_p3 = pnand %p1436_p2, %p1430_p13 }
 0x121   : > { %971 = vrot.lane.b32.xlu1 %v965_v46, %s1532_s26  ;;  %v467_v28 = vpop.permute.xlu0 %466  ;;  %v513_v33 = vpop.permute.xlu1 %512 }
 0x122   : > { %v469_v37 = vsel %vm419_vm0, %v465_v2, %v467_v28  ;;  %v475_v18 = vadd.f32 %v467_v28, %v451_v26  ;;  %v966_v2 = vmul.f32 %v1812_v32, %v1717_v14  ;;  %v1015_v26 = vmul.f32 %v1817_v34, %v1688_v59 }
 0x123   : > { %v474_v31 = vadd.f32 %v469_v37, %v450_v11  ;;  %925 = vrot.lane.b32.xlu0 %v918_v36, %s1532_s26  ;;  %v1039_v11 = vmul.f32 %v1827_v40, %v1705_v6  ;;  %v1064_v37 = vmul.f32 %v1838_v48, %v1736_v29 }
 0x125   : > { %975 = vrot.lane.b32.xlu1 %v967_v30, %s1532_s26  ;;  %v487_v38 = vpop.permute.xlu0 %486 }
 0x126   : > { %v492_v44 = vsel %vm419_vm0, %v487_v38, %v489_v15  ;;  %v538_v45 = vpop.permute.xlu1 %537 }
 0x127   : > { %v497_v52 = vadd.f32 %v492_v44, %v473_v25  ;;  %947 = vrot.lane.b32.xlu0 %v941_v43, %s1532_s26  ;;  %v1087_v44 = vmul.f32 %v1829_v42, %v1675_v49 }
 0x129   : > { %997 = vrot.lane.b32.xlu1 %v990_v24, %s1533_s28  ;;  %v491_v53 = vpop.permute.xlu0 %490 }
 0x12a   : > { %v493_v54 = vsel %vm419_vm0, %v489_v15, %v491_v53  ;;  %v499_v56 = vadd.f32 %v491_v53, %v475_v18  ;;  %v1040_v53 = vmul.f32 %v1827_v40, %v1725_v20 }
 0x12b   : > { %v498_v62 = vadd.f32 %v493_v54, %v474_v31  ;;  %v560_v63 = vpop.permute.xlu1 %559  ;;  %951 = vrot.lane.b32.xlu0 %v943_v13, %s1532_s26  ;;  %v1038_v31 = vmul.f32 %v1827_v40, %v1713_v12  ;;  %v1063_v40 = vmul.f32 %v1838_v48, %v1717_v14 }
 0x12d   : > { %1020 = vrot.lane.b32.xlu1 %v1014_v57, %s1533_s28  ;;  %v511_v0 = vpop.permute.xlu0 %510  ;;  %v1111_v57 = vmul.f32 %v1850_v55, %v1691_v60  ;;  %v1086_v60 = vmul.f32 %v1829_v42, %v1678_v50 }
 0x12e   : > { %v517_v3 = vsel %vm516_vm1, %v511_v0, %v513_v33 }
 0x12f   : > { %v522_v4 = vadd.f32 %v517_v3, %v497_v52  ;;  %v562_v23 = vpop.permute.xlu1 %561  ;;  %973 = vrot.lane.b32.xlu0 %v966_v2, %s1532_s26  ;;  %v1113_v3 = vmul.f32 %v1850_v55, %v1708_v7 }
 0x130   : > { %v565_v41 = vsel %vm516_vm1, %v560_v63, %v562_v23 }
 0x131   : > { %1024 = vrot.lane.b32.xlu1 %v1016_v27, %s1533_s28  ;;  %v515_v9 = vpop.permute.xlu0 %514 }
 0x132   : > { %v518_v10 = vsel %vm516_vm1, %v513_v33, %v515_v9  ;;  %v524_v32 = vadd.f32 %v515_v9, %v499_v56 }
 0x133   : > { %v523_v8 = vadd.f32 %v518_v10, %v498_v62  ;;  %v584_v15 = vpop.permute.xlu1 %583  ;;  %995 = vrot.lane.b32.xlu0 %v989_v5, %s1533_s28  ;;  %v1135_v5 = vmul.f32 %v1860_v1, %v1713_v12 }
 0x135   : > { %1046 = vrot.lane.b32.xlu1 %v1039_v11, %s1533_s28  ;;  %v536_v17 = vpop.permute.xlu0 %535 }
 0x136   : > { %v541_v19 = vsel %vm516_vm1, %v536_v17, %v538_v45 }
 0x137   : > { %v546_v46 = vadd.f32 %v541_v19, %v522_v4  ;;  %v588_v25 = vpop.permute.xlu1 %587  ;;  %999 = vrot.lane.b32.xlu0 %v991_v16, %s1533_s28  ;;  %v1112_v19 = vmul.f32 %v1850_v55, %v1688_v59 }
 0x139   : > { %1068 = vrot.lane.b32.xlu1 %v1062_v21, %s1533_s28  ;;  %v540_v28 = vpop.permute.xlu0 %539  ;;  %v570_v33 = vadd.f32 %v565_v41, %v546_v46  ;;  %v1159_v21 = vmul.f32 %v1840_v51, %v1728_v22 }
 0x13a   : > { %v542_v35 = vsel %vm516_vm1, %v538_v45, %v540_v28  ;;  %v548_v36 = vadd.f32 %v540_v28, %v524_v32  ;;  %v1088_v32 = vmul.f32 %v1829_v42, %v1685_v58  ;;  %v1161_v28 = vmul.f32 %v1840_v51, %v1736_v29 }
 0x13b   : > { %v547_v18 = vadd.f32 %v542_v35, %v523_v8  ;;  %v610_v30 = vpop.permute.xlu1 %609  ;;  %1022 = vrot.lane.b32.xlu0 %v1015_v26, %s1533_s28  ;;  %v1160_v29 = vmul.f32 %v1840_v51, %v1717_v14 }
 0x13d   : > { %1072 = vrot.lane.b32.xlu1 %v1064_v37, %s1533_s28  ;;  %v564_v34 = vpop.permute.xlu0 %563 }
 0x13e   : > { %v566_v38 = vsel %vm516_vm1, %v562_v23, %v564_v34  ;;  %v572_v43 = vadd.f32 %v564_v34, %v548_v36  ;;  %v1137_v36 = vmul.f32 %v1860_v1, %v1725_v20 }
 0x13f   : > { %v571_v45 = vadd.f32 %v566_v38, %v547_v18  ;;  %v633_v24 = vpop.permute.xlu1 %632  ;;  %1044 = vrot.lane.b32.xlu0 %v1038_v31, %s1533_s28 }
 0x140   : > { %v596_v52 = vadd.f32 %v588_v25, %v572_v43 }
 0x141   : > { %1094 = vrot.lane.b32.xlu1 %v1087_v44, %s1534_s29  ;;  %v586_v13 = vpop.permute.xlu0 %585 }
 0x142   : > { %v589_v54 = vsel %vm516_vm1, %v584_v15, %v586_v13  ;;  %v590_v56 = vsel %vm516_vm1, %v586_v13, %v588_v25  ;;  %v1136_v15 = vmul.f32 %v1860_v1, %v1705_v6  ;;  %v1179_v6 = vld [vmem:[%s2150_s2] sm:$0xff] }
 0x143   : > { %v594_v49 = vadd.f32 %v589_v54, %v570_v33  ;;  %v595_v62 = vadd.f32 %v590_v56, %v571_v45  ;;  %v637_v63 = vpop.permute.xlu1 %636  ;;  %1048 = vrot.lane.b32.xlu0 %v1040_v53, %s1533_s28 }
 0x145   : > { %1117 = vrot.lane.b32.xlu1 %v1111_v57, %s1534_s29  ;;  %v608_v0 = vpop.permute.xlu0 %607 }
 0x146   : > { %v614_v2 = vsel %vm613_vm2, %v608_v0, %v610_v30 }
 0x147   : > { %v619_v27 = vadd.f32 %v614_v2, %v594_v49  ;;  %v659_v4 = vpop.permute.xlu1 %658  ;;  %1070 = vrot.lane.b32.xlu0 %v1063_v40, %s1533_s28 }
 0x149   : > { %1121 = vrot.lane.b32.xlu1 %v1113_v3, %s1534_s29  ;;  %v612_v23 = vpop.permute.xlu0 %611 }
 0x14a   : > { %v615_v48 = vsel %vm613_vm2, %v610_v30, %v612_v23  ;;  %v621_v41 = vadd.f32 %v612_v23, %v596_v52 }
 0x14b   : > { %v620_v9 = vadd.f32 %v615_v48, %v595_v62  ;;  %v681_v10 = vpop.permute.xlu1 %680  ;;  %1092 = vrot.lane.b32.xlu0 %v1086_v60, %s1534_s29 }
 0x14c   : > { %v645_v7 = vadd.f32 %v637_v63, %v621_v41 }
 0x14d   : > { %1141 = vrot.lane.b32.xlu1 %v1135_v5, %s1534_s29  ;;  %v635_v50 = vpop.permute.xlu0 %634 }
 0x14e   : > { %v638_v11 = vsel %vm613_vm2, %v633_v24, %v635_v50  ;;  %v639_v8 = vsel %vm613_vm2, %v635_v50, %v637_v63 }
 0x14f   : > { %v643_v16 = vadd.f32 %v638_v11, %v619_v27  ;;  %v644_v12 = vadd.f32 %v639_v8, %v620_v9  ;;  %v685_v17 = vpop.permute.xlu1 %684  ;;  %1096 = vrot.lane.b32.xlu0 %v1088_v32, %s1534_s29 }
 0x151   : > { %1143 = vrot.lane.b32.xlu1 %v1136_v15, %s1534_s29  ;;  %v657_v58 = vpop.permute.xlu0 %656 }
 0x152   : > { %v662_v42 = vsel %vm613_vm2, %v657_v58, %v659_v4 }
 0x153   : > { %v667_v46 = vadd.f32 %v662_v42, %v643_v16  ;;  %v707_v25 = vpop.permute.xlu1 %706  ;;  %1119 = vrot.lane.b32.xlu0 %v1112_v19, %s1534_s29 }
 0x155   : > { %1165 = vrot.lane.b32.xlu1 %v1159_v21, %s1534_s29  ;;  %v661_v26 = vpop.permute.xlu0 %660 }
 0x156   : > { %v663_v59 = vsel %vm613_vm2, %v659_v4, %v661_v26  ;;  %v669_v55 = vadd.f32 %v661_v26, %v645_v7 }
 0x157   : > { %v668_v33 = vadd.f32 %v663_v59, %v644_v12  ;;  %v730_v35 = vpop.permute.xlu1 %729  ;;  %1182 = vperm.xlu0 %1426, %v1179_v6  }
 0x158   : > { %v693_v22 = vadd.f32 %v685_v17, %v669_v55 }
 0x159   : > { %1169 = vrot.lane.b32.xlu1 %v1161_v28, %s1534_s29  ;;  %v683_v37 = vpop.permute.xlu0 %682 }
 0x15a   : > { %v686_v18 = vsel %vm613_vm2, %v681_v10, %v683_v37  ;;  %v687_v30 = vsel %vm613_vm2, %v683_v37, %v685_v17 }
 0x15b   : > { %v691_v31 = vadd.f32 %v686_v18, %v667_v46  ;;  %v692_v34 = vadd.f32 %v687_v30, %v668_v33  ;;  %v734_v38 = vpop.permute.xlu1 %733  ;;  %1145 = vrot.lane.b32.xlu0 %v1137_v36, %s1534_s29 }
 0x15d   : > { %v705_v43 = vpop.permute.xlu0 %704 }
 0x15e   : > { %v711_v44 = vsel %vm710_vm3, %v705_v43, %v707_v25 }
 0x15f   : > { %v716_v20 = vadd.f32 %v711_v44, %v691_v31  ;;  %v756_v1 = vpop.permute.xlu1 %755  ;;  %1167 = vrot.lane.b32.xlu0 %v1160_v29, %s1534_s29  ;;  %s2106_s29 = scalar_lea.hbm %s2154_s6, %s1304_s18 }
 0x161   : > { %v709_v45 = vpop.permute.xlu0 %708 }
 0x162   : > { %v712_v24 = vsel %vm710_vm3, %v707_v25, %v709_v45  ;;  %v718_v52 = vadd.f32 %v709_v45, %v693_v22 }
 0x163   : > { %v717_v53 = vadd.f32 %v712_v24, %v692_v34  ;;  %v778_v13 = vpop.permute.xlu1 %777 }
 0x164   : > { %v742_v54 = vadd.f32 %v734_v38, %v718_v52 }
 0x165   : > { %v732_v56 = vpop.permute.xlu0 %731 }
 0x166   : > { %v735_v57 = vsel %vm710_vm3, %v730_v35, %v732_v56  ;;  %v736_v49 = vsel %vm710_vm3, %v732_v56, %v734_v38 }
 0x167   : > { %v740_v14 = vadd.f32 %v735_v57, %v716_v20  ;;  %v741_v51 = vadd.f32 %v736_v49, %v717_v53  ;;  %v782_v62 = vpop.permute.xlu1 %781 }
 0x169   : > { %v754_v63 = vpop.permute.xlu0 %753 }
 0x16a   : > { %v759_v40 = vsel %vm710_vm3, %v754_v63, %v756_v1 }
 0x16b   : > { %v764_v0 = vadd.f32 %v759_v40, %v740_v14  ;;  %v804_v2 = vpop.permute.xlu1 %803 }
 0x16d   : > { %v758_v3 = vpop.permute.xlu0 %757 }
 0x16e   : > { %v760_v27 = vsel %vm710_vm3, %v756_v1, %v758_v3  ;;  %v766_v4 = vadd.f32 %v758_v3, %v742_v54 }
 0x16f   : > { %v765_v60 = vadd.f32 %v760_v27, %v741_v51  ;;  %v827_v23 = vpop.permute.xlu1 %826 }
 0x170   : > { %v790_v48 = vadd.f32 %v782_v62, %v766_v4 }
 0x171   : > { %v780_v41 = vpop.permute.xlu0 %779 }
 0x172   : > { %v783_v5 = vsel %vm710_vm3, %v778_v13, %v780_v41  ;;  %v784_v9 = vsel %vm710_vm3, %v780_v41, %v782_v62 }
 0x173   : > { %v788_v10 = vadd.f32 %v783_v5, %v764_v0  ;;  %v789_v7 = vadd.f32 %v784_v9, %v765_v60  ;;  %v831_v32 = vpop.permute.xlu1 %830 }
 0x175   : > { %v802_v50 = vpop.permute.xlu0 %801 }
 0x176   : > { %v808_v11 = vsel %vm807_vm4, %v802_v50, %v804_v2 }
 0x177   : > { %v813_v8 = vadd.f32 %v808_v11, %v788_v10  ;;  %v853_v15 = vpop.permute.xlu1 %852 }
 0x179   : > { %v806_v16 = vpop.permute.xlu0 %805 }
 0x17a   : > { %v809_v12 = vsel %vm807_vm4, %v804_v2, %v806_v16  ;;  %v815_v52 = vadd.f32 %v806_v16, %v790_v48 }
 0x17b   : > { %v814_v17 = vadd.f32 %v809_v12, %v789_v7  ;;  %v875_v19 = vpop.permute.xlu1 %874 }
 0x17c   : > { %v839_v54 = vadd.f32 %v831_v32, %v815_v52 }
 0x17d   : > { %v829_v58 = vpop.permute.xlu0 %828 }
 0x17e   : > { %v832_v42 = vsel %vm807_vm4, %v827_v23, %v829_v58  ;;  %v833_v40 = vsel %vm807_vm4, %v829_v58, %v831_v32 }
 0x17f   : > { %v837_v21 = vadd.f32 %v832_v42, %v813_v8  ;;  %v879_v46 = vpop.permute.xlu1 %878  ;;  %v838_v60 = vadd.f32 %v833_v40, %v814_v17 }
 0x181   : > { %v851_v25 = vpop.permute.xlu0 %850 }
 0x182   : > { %v856_v0 = vsel %vm807_vm4, %v851_v25, %v853_v15 }
 0x183   : > { %v901_v6 = vpop.permute.xlu1 %900  ;;  %v861_v23 = vadd.f32 %v856_v0, %v837_v21 }
 0x185   : > { %v855_v26 = vpop.permute.xlu0 %854 }
 0x186   : > { %v863_v56 = vadd.f32 %v855_v26, %v839_v54  ;;  %v857_v3 = vsel %vm807_vm4, %v853_v15, %v855_v26 }
 0x187   : > { %v924_v59 = vpop.permute.xlu1 %923  ;;  %v862_v9 = vadd.f32 %v857_v3, %v838_v60 }
 0x188   : > { %v887_v14 = vadd.f32 %v879_v46, %v863_v56 }
 0x189   : > { %v877_v55 = vpop.permute.xlu0 %876 }
 0x18a   : > { %v880_v27 = vsel %vm807_vm4, %v875_v19, %v877_v55  ;;  %v881_v41 = vsel %vm807_vm4, %v877_v55, %v879_v46 }
 0x18b   : > { %v928_v28 = vpop.permute.xlu1 %927  ;;  %v885_v10 = vadd.f32 %v880_v27, %v861_v23  ;;  %v886_v8 = vadd.f32 %v881_v41, %v862_v9 }
 0x18d   : > { %v899_v33 = vpop.permute.xlu0 %898 }
 0x18e   : > { %v905_v5 = vsel %vm904_vm5, %v899_v33, %v901_v6 }
 0x18f   : > { %v950_v35 = vpop.permute.xlu1 %949  ;;  %v910_v15 = vadd.f32 %v905_v5, %v885_v10 }
 0x191   : > { %v903_v22 = vpop.permute.xlu0 %902 }
 0x192   : > { %v912_v51 = vadd.f32 %v903_v22, %v887_v14  ;;  %v906_v32 = vsel %vm904_vm5, %v901_v6, %v903_v22 }
 0x193   : > { %v972_v36 = vpop.permute.xlu1 %971  ;;  %v911_v19 = vadd.f32 %v906_v32, %v886_v8 }
 0x194   : > { %v936_v2 = vadd.f32 %v928_v28, %v912_v51 }
 0x195   : > { %v926_v37 = vpop.permute.xlu0 %925 }
 0x196   : > { %v929_v50 = vsel %vm904_vm5, %v924_v59, %v926_v37  ;;  %v930_v16 = vsel %vm904_vm5, %v926_v37, %v928_v28 }
 0x197   : > { %v976_v18 = vpop.permute.xlu1 %975  ;;  %v934_v58 = vadd.f32 %v929_v50, %v910_v15  ;;  %v935_v25 = vadd.f32 %v930_v16, %v911_v19 }
 0x199   : > { %v948_v30 = vpop.permute.xlu0 %947 }
 0x19a   : > { %v953_v12 = vsel %vm904_vm5, %v948_v30, %v950_v35 }
 0x19b   : > { %v998_v31 = vpop.permute.xlu1 %997  ;;  %v958_v6 = vadd.f32 %v953_v12, %v934_v58 }
 0x19d   : > { %v952_v34 = vpop.permute.xlu0 %951 }
 0x19e   : > { %v960_v4 = vadd.f32 %v952_v34, %v936_v2  ;;  %v954_v21 = vsel %vm904_vm5, %v950_v35, %v952_v34 }
 0x19f   : > { %v1021_v38 = vpop.permute.xlu1 %1020  ;;  %v959_v28 = vadd.f32 %v954_v21, %v935_v25 }
 0x1a0   : > { %v984_v11 = vadd.f32 %v976_v18, %v960_v4 }
 0x1a1   : > { %v974_v29 = vpop.permute.xlu0 %973 }
 0x1a2   : > { %v977_v46 = vsel %vm904_vm5, %v972_v36, %v974_v29  ;;  %v978_v59 = vsel %vm904_vm5, %v974_v29, %v976_v18 }
 0x1a3   : > { %v1025_v43 = vpop.permute.xlu1 %1024  ;;  %v982_v22 = vadd.f32 %v977_v46, %v958_v6  ;;  %v983_v54 = vadd.f32 %v978_v59, %v959_v28 }
 0x1a5   : > { %v996_v44 = vpop.permute.xlu0 %995 }
 0x1a6   : > { %v1002_v55 = vsel %vm1001_vm6, %v996_v44, %v998_v31 }
 0x1a7   : > { %v2042_v20 = vpop.permute.xlu1 %1046  ;;  %v1007_v56 = vadd.f32 %v1002_v55, %v982_v22 }
 0x1a9   : > { %v1000_v1 = vpop.permute.xlu0 %999 }
 0x1aa   : > { %v1009_v17 = vadd.f32 %v1000_v1, %v984_v11  ;;  %v1003_v37 = vsel %vm1001_vm6, %v998_v31, %v1000_v1 }
 0x1ab   : > { %v2044_v45 = vpop.permute.xlu1 %1068  ;;  %v1008_v14 = vadd.f32 %v1003_v37, %v983_v54 }
 0x1ac   : > { %v1033_v33 = vadd.f32 %v1025_v43, %v1009_v17 }
 0x1ad   : > { %v1023_v24 = vpop.permute.xlu0 %1022 }
 0x1ae   : > { %v1026_v30 = vsel %vm1001_vm6, %v1021_v38, %v1023_v24  ;;  %v1027_v36 = vsel %vm1001_vm6, %v1023_v24, %v1025_v43 }
 0x1af   : > { %v2046_v53 = vpop.permute.xlu1 %1072  ;;  %v1031_v18 = vadd.f32 %v1026_v30, %v1007_v56  ;;  %v1032_v1 = vadd.f32 %v1027_v36, %v1008_v14  ;;  %v1227_v36 = vld [vmem:[%s2153_s5] sm:$0x1] }
 0x1b1   : > { %v1045_v13 = vpop.permute.xlu0 %1044 }
 0x1b2   : > { %v1050_v34 = vsel %vm1001_vm6, %v1045_v13, %v2042_v20 }
 0x1b3   : > { %v2048_v57 = vpop.permute.xlu1 %1094  ;;  %v1055_v51 = vadd.f32 %v1050_v34, %v1031_v18 }
 0x1b5   : > { %v1049_v49 = vpop.permute.xlu0 %1048 }
 0x1b6   : > { %v1057_v52 = vadd.f32 %v1049_v49, %v1033_v33  ;;  %v1051_v44 = vsel %vm1001_vm6, %v2042_v20, %v1049_v49 }
 0x1b7   : > { %v2050_v62 = vpop.permute.xlu1 %1117  ;;  %v1056_v40 = vadd.f32 %v1051_v44, %v1032_v1 }
 0x1b8   : > { %v1081_v38 = vadd.f32 %v2046_v53, %v1057_v52 }
 0x1b9   : > { %v1071_v63 = vpop.permute.xlu0 %1070 }
 0x1ba   : > { %v1074_v31 = vsel %vm1001_vm6, %v2044_v45, %v1071_v63  ;;  %v1075_v43 = vsel %vm1001_vm6, %v1071_v63, %v2046_v53 }
 0x1bb   : > { %v1122_v48 = vpop.permute.xlu1 %1121  ;;  %v1079_v0 = vadd.f32 %v1074_v31, %v1055_v51  ;;  %v1080_v49 = vadd.f32 %v1075_v43, %v1056_v40 }
 0x1bd   : > { %v1093_v7 = vpop.permute.xlu0 %1092 }
 0x1be   : > { %v1099_v24 = vsel %vm1098_vm7, %v1093_v7, %v2048_v57 }
 0x1bf   : > { %v1142_v42 = vpop.permute.xlu1 %1141  ;;  %v1104_v27 = vadd.f32 %v1099_v24, %v1079_v0 }
 0x1c1   : > { %v1097_v26 = vpop.permute.xlu0 %1096 }
 0x1c2   : > { %v1106_v13 = vadd.f32 %v1097_v26, %v1081_v38  ;;  %v1100_v20 = vsel %vm1098_vm7, %v2048_v57, %v1097_v26 }
 0x1c3   : > { %v1144_v35 = vpop.permute.xlu1 %1143  ;;  %v1105_v53 = vadd.f32 %v1100_v20, %v1080_v49 }
 0x1c4   : > { %v1130_v60 = vadd.f32 %v1122_v48, %v1106_v13  ;;  %v1147_v7 = vsel %vm1098_vm7, %v1142_v42, %v1144_v35 }
 0x1c5   : > { %v1120_v29 = vpop.permute.xlu0 %1119 }
 0x1c6   : > { %v1123_v45 = vsel %vm1098_vm7, %v2050_v62, %v1120_v29  ;;  %v1124_v4 = vsel %vm1098_vm7, %v1120_v29, %v1122_v48  ;;  %v1191_v62 = vld [vmem:[%s2151_s3] sm:$0x7] }
 0x1c7   : > { %v1166_v2 = vpop.permute.xlu1 %1165  ;;  %v1128_v63 = vadd.f32 %v1123_v45, %v1104_v27  ;;  %v1129_v9 = vadd.f32 %v1124_v4, %v1105_v53  ;;  %v1204_v19 = vrot.slane %v1191_v62, %v1695_v61  ;;  %v1196_v58 = vrot.slane %v1191_v62, %v1665_v39  ;;  %v1217_v39 = vld [vmem:[%s2152_s4] sm:$0xff] }
 0x1c8   : > { %v1200_v42 = vrot.slane %v1191_v62, %v1672_v47 }
 0x1c9   : > { %v1152_v11 = vadd.f32 %v1147_v7, %v1128_v63 }
 0x1cb   : > { %v1170_v10 = vpop.permute.xlu1 %1169 }
 0x1d6   : > { %v1183_v3 = vpop.permute.xlu0 %1182 }
 0x1da   : > { %v1146_v23 = vpop.permute.xlu0 %1145 }
 0x1db   : > { %v1148_v41 = vsel %vm1098_vm7, %v1144_v35, %v1146_v23  ;;  %v1154_v5 = vadd.f32 %v1146_v23, %v1130_v60 }
 0x1dc   : > { %v1153_v57 = vadd.f32 %v1148_v41, %v1129_v9 }
 0x1dd   : > { %v1178_v32 = vadd.f32 %v1170_v10, %v1154_v5 }
 0x1de   : > { %v1168_v50 = vpop.permute.xlu0 %1167 }
 0x1df   : > { %v1187_v8 = vadd.f32 %v1183_v3, %v1178_v32  ;;  %v1171_v48 = vsel %vm1098_vm7, %v1166_v2, %v1168_v50  ;;  %v1172_v15 = vsel %vm1098_vm7, %v1168_v50, %v1170_v10 }
 0x1e0   : > { %v1176_v16 = vadd.f32 %v1171_v48, %v1152_v11  ;;  %v1177_v12 = vadd.f32 %v1172_v15, %v1153_v57 }
 0x1e1   : > { %v1190_v17 = vmax.f32 %v1187_v8, 0.0 }
 0x1e2   : > { %v1185_v21 = vadd.f32 %v1183_v3, %v1176_v16  ;;  %v1186_v46 = vadd.f32 %v1183_v3, %v1177_v12 }
 0x1e3   : > { %v1210_v26 = vmul.f32 %v1204_v19, %v1190_v17 }
 0x1e4   : > { %v1188_v25 = vmax.f32 %v1185_v21, 0.0  ;;  %v1189_v6 = vmax.f32 %v1186_v46, 0.0 }
 0x1e5   : > { %v1213_v28 = vsel %vm1212_vm8, %v1210_v26, 0.0 }
 0x1e6   : > { %v1208_v59 = vmul.f32 %v1196_v58, %v1188_v25  ;;  %v1209_v55 = vmul.f32 %v1200_v42, %v1189_v6 }
 0x1e8   : > { %v1211_v33 = vadd.f32 %v1209_v55, %v1208_v59 }
 0x1ea   : > { %v1214_v22 = vadd.f32 %v1213_v28, %v1211_v33 }
 0x1ec   : > { %1215 = vadd.xlane.f32.xlu0 %v1214_v22 }
 0x279   : > { %v1216_v47 = vpop.xlane.xlu0 %1215 }
 0x27a   : > { %v1218_v61 = vmul.f32 %v1217_v39, %v1216_v47 }
 0x27c   : > { %v1220_v37 = vsel %vm1219_vm9, %v1218_v61, 0.0 }
 0x27d   : > { %v1221_v30 = vrot.slane %v1220_v37, 4 }
 0x27f   : > { %v1222_v52 = vadd.f32 %v1221_v30, %v1220_v37 }
 0x281   : > { %v1223_v54 = vrot.slane %v1222_v52, 2 }
 0x283   : > { %v1224_v56 = vadd.f32 %v1223_v54, %v1222_v52 }
 0x285   : > { %v1225_v35 = vrot.slane %v1224_v56, 1 }
 0x287   : > { %v1226_v34 = vadd.f32 %v1225_v35, %v1224_v56 }
 0x289   : > { %v1228_v14 = vadd.f32 %v1227_v36, %v1226_v34 }
 0x28b   : > { %1230 = vst.msk [vmem:[%s243_s19] sm:$0x1] %vm1229_vm10, %v1228_v14 }
 0x28c   : > { %1440 = shalt.err (!%p1437_p3)
}
 0x28d   : > { %s1441_s13 = scalar_lea.hbm %s2106_s29, 16  ;;  %s1445_s16 = scalar_lea.hbm %s2154_s6, 32 }
 0x28e   : > { %p1442_p4 = scmp.ne.s32.totalorder %s2106_s29, %s1441_s13  ;;  %p1446_p9 = scmp.lt.u32.totalorder %s2106_s29, %s2154_s6 }
 0x28f   : > { %p1447_p10 = scmp.lt.u32.totalorder %s1445_s16, %s1441_s13  ;;  %p1449_p12 = scmp.lt.u32.totalorder %s1441_s13, %s2106_s29 }
 0x290   : > { %p1443_p7 = pnand %p1442_p4, %p1609_p5 }
 0x291   : > { %p1448_p11 = por %p1447_p10, %p1446_p9 }
 0x292   : > { %p1444_p8 = pneg %p1443_p7 }
 0x293   : > { %p1450_p13 = por %p1449_p12, %p1448_p11 }
 0x295   : > { %p1451_p0 = pnand %p1450_p13, %p1444_p8 }
 0x297   : > { %1454 = shalt.err (!%p1451_p0)
}
 0x298   : > { %1308 = dma.vmem_to_hbm [thread:$0]  (%p1609_p5), %s2108_s20, 16, %s2106_s29, %s1232_s9  }
 0x299 PF: > { %p1314_p1 = scmp.ge.s32.totalorder %s1489_s24, 2  ;;  %s1256_s19 = sand.u32 1, %s1477_s21  }
 0x29a   : > { %s1257_s26 = scalar_lea.sflag [#allocation3], %s1256_s19 }
 0x29b   : > { %p1311_p2 = pnand %p1314_p1, %p1613_p6 }
 0x29d   : > { %1472 = dma.done.wait (!%p1311_p2), %s1257_s26, 16  }
 0x29e   : > { %1474 = vsyncadd (!%p1311_p2), %s1257_s26, 4294967280  ;;  %p16_p3 = scmp.ge.s32.totalorder %s1596_s27, 4   ;;  %s2157_s21 = smov %s1481_s22 }
 0x29f   : > { %s2158_s22 = smov %s1485_s23  ;;  %s2159_s23 = smov %s1607_s30 }
 0x2a0   : > { %s2160_s24 = smov %s1596_s27  ;;  %18 = sbr.rel (!%p16_p3) target bundleno = 3 (0x3), region = 79 }
 0x2a7   :  { %1261 = vsyncpa [#allocation3], 1 }
 0x2a8   :  { %1263 = vsyncpa [#allocation3 + $0x1], 1 }

</bundles_post_ra>
